<compile_context>
chip_gen: v7x
topology: tpu7x:2x2x1
jax: 0.10.0
libtpu: 0.0.40
codegen_flags: <defaults>
</compile_context>

<pallas_src>
import functools
import jax
import jax.numpy as jnp
from jax.experimental import pallas as pl
from jax.experimental.pallas import tpu as pltpu

# ---- small synthetic config ----
B = 2
N = 16                 # n_max_nodes
F_IN = 8               # input_dim
H_ENC = 32             # hidden_dim_enc (GIN output dim == hidden_dim_enc)
H_DEC = 64             # hidden_dim_dec
LATENT = 16            # latent_dim
N_COND = 7             # n_cond
LANE = 128             # lane-dense padding of every hidden width
N_PAIRS = N * (N - 1) // 2          # 120 upper-triangular edges


# ----------------------------------------------------------------------------
# single fused kernel: GIN encoder + heads + reparam + decoder + gumbel + scatter
# ----------------------------------------------------------------------------
def _ccvgae_kernel(x_ref, a_ref, dyn_ref, w_ref, misc_ref, scat_ref, out_ref):
    f32 = jnp.float32

    def dot(a, b):
        return jnp.dot(a, b, preferred_element_type=f32)

    def leaky(t):
        return jnp.where(t > 0, t, 0.2 * t)

    misc = misc_ref[...]                       # (32, 128) packed weight/bias/stat bank
    w_in = misc[0:F_IN]                        # (8, 128) GIN first linear (cols 0:32 real)
    b1a, b1b = misc[8:9], misc[9:10]
    b2a, b2b = misc[10:11], misc[11:12]
    bfc = misc[12:13]
    bmu, blv = misc[13:14], misc[14:15]
    bd0, bd1 = misc[15:16], misc[16:17]
    b2d = misc[17:18]
    mean, inv_std = misc[18:19], misc[19:20]   # 1/std pre-computed at init

    # ---- GIN encoder (two conv layers; activations lane-padded to 128) ----
    x3 = x_ref[...]                            # (B, N, F_IN)
    a3 = a_ref[...]                            # (B, N, N)
    m = (x3 + jnp.einsum('bij,bjf->bif', a3, x3,
                         preferred_element_type=f32)).reshape(B * N, F_IN)
    t = leaky(dot(m, w_in) + b1a)              # (B*N, 128), lanes >=32 stay exactly 0
    t = leaky(dot(t, w_ref[0]) + b1b)

    t3 = t.reshape(B, N, LANE)
    m = (t3 + jnp.einsum('bij,bjf->bif', a3, t3,
                         preferred_element_type=f32)).reshape(B * N, LANE)
    t = leaky(dot(m, w_ref[1]) + b2a)
    t = leaky(dot(t, w_ref[2]) + b2b)

    x_g = jnp.sum(t.reshape(B, N, LANE), axis=1)   # global add pool -> (B, 128)
    x_g = dot(x_g, w_ref[3]) + bfc

    # ---- fused fc_mu / fc_logvar + reparameterize (training branch) ----
    mu = dot(x_g, w_ref[4]) + bmu
    logvar = dot(x_g, w_ref[5]) + blv

    dyn = dyn_ref[...]                         # (B, 512): [stats | eps | stats-noise | logistic]
    stats_in = dyn[:, 0:LANE]
    eps = dyn[:, LANE:2 * LANE]
    s_noise = dyn[:, 2 * LANE:3 * LANE]
    logistic = dyn[:, 3 * LANE:4 * LANE]

    z = mu + eps * jnp.exp(0.5 * logvar)       # pad-lane garbage killed by zero rows of w_ref[6]
    s = (stats_in - mean) * inv_std + 0.1 * s_noise

    # ---- decoder MLP; x = cat([z, stats]) realized as a split first matmul ----
    hd = jnp.maximum(dot(z, w_ref[6]) + dot(s, w_ref[7]) + bd0, 0.0)
    hd = jnp.maximum(dot(hd, w_ref[8]) + bd1, 0.0)

    # hard gumbel-softmax (tau=1) over 2 classes == sign test on the class-difference
    # logits plus Logistic(0,1) noise (g0 - g1 ~ Logistic); class-0 == "edge present".
    logit_diff = dot(hd, w_ref[9]) + b2d       # (B, 128); 120 real pairs
    bits = jnp.where(logit_diff + logistic >= 0.0, 1.0, 0.0)

    # symmetric upper-triangular scatter as one small matmul (lane-dense output)
    out_ref[...] = dot(bits, scat_ref[...])    # (B, N*N)


def _pallas_forward(x_nodes, adj_in, dyn, p):
    vmem = lambda: pl.BlockSpec(memory_space=pltpu.MemorySpace.VMEM)
    cost = pl.CostEstimate(flops=4_000_000, transcendentals=B * LANE,
                           bytes_accessed=850_000)
    return pl.pallas_call(
        _ccvgae_kernel,
        out_shape=jax.ShapeDtypeStruct((B, N * N), jnp.float32),
        in_specs=[vmem() for _ in range(6)],
        out_specs=vmem(),
        cost_estimate=cost,
    )(x_nodes, adj_in, dyn, p["w_slab"], p["misc"], p["scatter"])


# ----------------------------------------------------------------------------
# full forward (wrapper does only noise generation + layout plumbing)
# ----------------------------------------------------------------------------
def forward(params, x_nodes, adj_in, stats, key):
    k_eps, k_sn, k_lg = jax.random.split(key, 3)
    stats_pad = jnp.zeros((B, LANE), jnp.float32).at[:, :N_COND].set(stats)
    dyn = jnp.concatenate(
        [stats_pad,
         jax.random.normal(k_eps, (B, LANE), jnp.float32),    # eps (reparameterize)
         jax.random.normal(k_sn, (B, LANE), jnp.float32),     # stats noise
         jax.random.logistic(k_lg, (B, LANE), jnp.float32)],  # gumbel diff noise
        axis=1)                                               # (B, 512) lane-dense
    adj_flat = _pallas_forward(x_nodes, adj_in, dyn, params)
    return adj_flat.reshape(B, N, N)


# ----------------------------------------------------------------------------
# deterministic synthetic parameters (pre-packed, lane-dense layouts)
# ----------------------------------------------------------------------------
def init_params(key):
    ks = iter(jax.random.split(key, 32))
    rnd = lambda shape, scale=0.1: scale * jax.random.normal(next(ks), shape, jnp.float32)

    # 10 square (128,128) weight planes, zero-padded so padded lanes stay exact.
    w_slab = jnp.zeros((10, LANE, LANE), jnp.float32)
    w_slab = w_slab.at[0, :H_ENC, :H_ENC].set(rnd((H_ENC, H_ENC)))   # GIN mlp1 linear 2
    w_slab = w_slab.at[1, :H_ENC, :H_ENC].set(rnd((H_ENC, H_ENC)))   # GIN mlp2 linear 1
    w_slab = w_slab.at[2, :H_ENC, :H_ENC].set(rnd((H_ENC, H_ENC)))   # GIN mlp2 linear 2
    w_slab = w_slab.at[3, :H_ENC, :H_ENC].set(rnd((H_ENC, H_ENC)))   # GIN readout fc
    w_slab = w_slab.at[4, :H_ENC, :LATENT].set(rnd((H_ENC, LATENT))) # fc_mu
    w_slab = w_slab.at[5, :H_ENC, :LATENT].set(rnd((H_ENC, LATENT))) # fc_logvar
    w_slab = w_slab.at[6, :LATENT, :H_DEC].set(rnd((LATENT, H_DEC))) # decoder W0, z rows
    w_slab = w_slab.at[7, :N_COND, :H_DEC].set(rnd((N_COND, H_DEC))) # decoder W0, stats rows
    w_slab = w_slab.at[8, :H_DEC, :H_DEC].set(rnd((H_DEC, H_DEC)))   # decoder W1
    # final edge-logit weight folded to (class0 - class1): halves the last matmul N
    w_slab = w_slab.at[9, :H_DEC, :N_PAIRS].set(
        rnd((H_DEC, N_PAIRS)) - rnd((H_DEC, N_PAIRS)))

    # misc bank (32, 128): rows 0:8 GIN first linear weight, rows 8:17 biases,
    # rows 18/19 stats mean and 1/std (reciprocal pre-computed).
    misc = jnp.zeros((32, LANE), jnp.float32)
    misc = misc.at[0:F_IN, :H_ENC].set(rnd((F_IN, H_ENC)))
    misc = misc.at[8, :H_ENC].set(rnd((H_ENC,)))           # b1a
    misc = misc.at[9, :H_ENC].set(rnd((H_ENC,)))           # b1b
    misc = misc.at[10, :H_ENC].set(rnd((H_ENC,)))          # b2a
    misc = misc.at[11, :H_ENC].set(rnd((H_ENC,)))          # b2b
    misc = misc.at[12, :H_ENC].set(rnd((H_ENC,)))          # bfc
    misc = misc.at[13, :LATENT].set(rnd((LATENT,)))        # b_mu
    misc = misc.at[14, :LATENT].set(rnd((LATENT,)))        # b_logvar
    misc = misc.at[15, :H_DEC].set(rnd((H_DEC,)))          # bd0
    misc = misc.at[16, :H_DEC].set(rnd((H_DEC,)))          # bd1
    misc = misc.at[17, :N_PAIRS].set(rnd((N_PAIRS,)) - rnd((N_PAIRS,)))  # b2 diff
    stats_mean = rnd((N_COND,))
    stats_std = 0.5 + jnp.abs(rnd((N_COND,)))
    misc = misc.at[18, :N_COND].set(stats_mean)
    misc = misc.at[19, :N_COND].set(1.0 / stats_std)

    # constant symmetric upper-triangular scatter matrix (rows >= N_PAIRS are 0)
    iu0, iu1 = jnp.triu_indices(N, k=1)
    scat = jnp.zeros((LANE, N * N), jnp.float32)
    scat = scat.at[jnp.arange(N_PAIRS), iu0 * N + iu1].set(1.0)
    scat = scat.at[jnp.arange(N_PAIRS), iu1 * N + iu0].set(1.0)

    return {"w_slab": w_slab, "misc": misc, "scatter": scat}


if __name__ == "__main__":
    key = jax.random.PRNGKey(0)
    kp, kx, ka, ks, kn = jax.random.split(key, 5)

    params = init_params(kp)
    x_nodes = jax.random.normal(kx, (B, N, F_IN), jnp.float32)
    a_up = (jax.random.uniform(ka, (B, N, N)) < 0.3).astype(jnp.float32)
    a_up = jnp.triu(a_up, k=1)
    adj_in = a_up + jnp.transpose(a_up, (0, 2, 1))
    stats = jax.random.normal(ks, (B, N_COND), jnp.float32)

    fwd = jax.jit(functools.partial(forward, params))
    adj = jax.block_until_ready(fwd(x_nodes, adj_in, stats, kn))

    assert adj.shape == (B, N, N)
    assert bool(jnp.all(jnp.isfinite(adj)))
    assert bool(jnp.allclose(adj, jnp.transpose(adj, (0, 2, 1))))  # symmetric output
    assert bool(jnp.all((adj == 0.0) | (adj == 1.0)))              # hard gumbel bits
    print("KERNEL_OK")
</pallas_src>

<mosaic_0001>
module attributes {stable_mosaic.version = 11 : i64} {
  func.func @_ccvgae_kernel(%arg0: memref<2x16x8xf32, #tpu.memory_space<vmem>>, %arg1: memref<2x16x16xf32, #tpu.memory_space<vmem>>, %arg2: memref<2x512xf32, #tpu.memory_space<vmem>>, %arg3: memref<10x128x128xf32, #tpu.memory_space<vmem>>, %arg4: memref<32x128xf32, #tpu.memory_space<vmem>>, %arg5: memref<128x256xf32, #tpu.memory_space<vmem>>, %arg6: memref<2x256xf32, #tpu.memory_space<vmem>>) attributes {dimension_semantics = [], scalar_prefetch = 0 : i64, scratch_operands = 0 : i64, tpu.core_type = #tpu.core_type<tc>} {
    %c0 = arith.constant 0 : index
    %c0_0 = arith.constant 0 : index
    %0 = vector.load %arg4[%c0, %c0_0] : memref<32x128xf32, #tpu.memory_space<vmem>>, vector<32x128xf32>
    %1 = vector.extract_strided_slice %0 {offsets = [0, 0], sizes = [8, 128], strides = [1, 1]} : vector<32x128xf32> to vector<8x128xf32>
    %2 = vector.extract_strided_slice %0 {offsets = [8, 0], sizes = [1, 128], strides = [1, 1]} : vector<32x128xf32> to vector<1x128xf32>
    %3 = vector.extract_strided_slice %0 {offsets = [9, 0], sizes = [1, 128], strides = [1, 1]} : vector<32x128xf32> to vector<1x128xf32>
    %4 = vector.extract_strided_slice %0 {offsets = [10, 0], sizes = [1, 128], strides = [1, 1]} : vector<32x128xf32> to vector<1x128xf32>
    %5 = vector.extract_strided_slice %0 {offsets = [11, 0], sizes = [1, 128], strides = [1, 1]} : vector<32x128xf32> to vector<1x128xf32>
    %6 = vector.extract_strided_slice %0 {offsets = [12, 0], sizes = [1, 128], strides = [1, 1]} : vector<32x128xf32> to vector<1x128xf32>
    %7 = vector.extract_strided_slice %0 {offsets = [13, 0], sizes = [1, 128], strides = [1, 1]} : vector<32x128xf32> to vector<1x128xf32>
    %8 = vector.extract_strided_slice %0 {offsets = [14, 0], sizes = [1, 128], strides = [1, 1]} : vector<32x128xf32> to vector<1x128xf32>
    %9 = vector.extract_strided_slice %0 {offsets = [15, 0], sizes = [1, 128], strides = [1, 1]} : vector<32x128xf32> to vector<1x128xf32>
    %10 = vector.extract_strided_slice %0 {offsets = [16, 0], sizes = [1, 128], strides = [1, 1]} : vector<32x128xf32> to vector<1x128xf32>
    %11 = vector.extract_strided_slice %0 {offsets = [17, 0], sizes = [1, 128], strides = [1, 1]} : vector<32x128xf32> to vector<1x128xf32>
    %12 = vector.extract_strided_slice %0 {offsets = [18, 0], sizes = [1, 128], strides = [1, 1]} : vector<32x128xf32> to vector<1x128xf32>
    %13 = vector.extract_strided_slice %0 {offsets = [19, 0], sizes = [1, 128], strides = [1, 1]} : vector<32x128xf32> to vector<1x128xf32>
    %c0_1 = arith.constant 0 : index
    %c0_2 = arith.constant 0 : index
    %c0_3 = arith.constant 0 : index
    %14 = vector.load %arg0[%c0_1, %c0_2, %c0_3] : memref<2x16x8xf32, #tpu.memory_space<vmem>>, vector<2x16x8xf32>
    %c0_4 = arith.constant 0 : index
    %c0_5 = arith.constant 0 : index
    %c0_6 = arith.constant 0 : index
    %15 = vector.load %arg1[%c0_4, %c0_5, %c0_6] : memref<2x16x16xf32, #tpu.memory_space<vmem>>, vector<2x16x16xf32>
    "tpu.trace_start"() <{level = 10 : i32, message = "bij,bjf->bif"}> : () -> ()
    %cst = arith.constant dense<0.000000e+00> : vector<2x16x8xf32>
    %16 = tpu.matmul %15, %14, %cst {dimension_numbers = #tpu.dot_dimension_numbers<[2], [1], [1], [2], [0, 0, 0, 1, 1, 2], [0], [0]>} : vector<2x16x16xf32>, vector<2x16x8xf32>, vector<2x16x8xf32> -> vector<2x16x8xf32>
    "tpu.trace_stop"() : () -> ()
    %17 = arith.addf %14, %16 : vector<2x16x8xf32>
    %18 = vector.shape_cast %17 : vector<2x16x8xf32> to vector<32x8xf32>
    %cst_7 = arith.constant dense<0.000000e+00> : vector<32x128xf32>
    %19 = tpu.matmul %18, %1, %cst_7 {dimension_numbers = #tpu.dot_dimension_numbers<[1], [0], [0], [1], [0, 0, 1, 1], [], []>} : vector<32x8xf32>, vector<8x128xf32>, vector<32x128xf32> -> vector<32x128xf32>
    %20 = vector.broadcast %2 : vector<1x128xf32> to vector<32x128xf32>
    %21 = arith.addf %19, %20 : vector<32x128xf32>
    %cst_8 = arith.constant 0.000000e+00 : f32
    %22 = vector.broadcast %cst_8 : f32 to vector<32x128xf32>
    %23 = arith.cmpf ogt, %21, %22 : vector<32x128xf32>
    %cst_9 = arith.constant 2.000000e-01 : f32
    %24 = vector.broadcast %cst_9 : f32 to vector<32x128xf32>
    %25 = arith.mulf %24, %21 : vector<32x128xf32>
    %26 = arith.select %23, %21, %25 : vector<32x128xi1>, vector<32x128xf32>
    %c0_10 = arith.constant 0 : index
    %c0_11 = arith.constant 0 : index
    %c0_12 = arith.constant 0 : index
    %27 = vector.load %arg3[%c0_10, %c0_11, %c0_12] : memref<10x128x128xf32, #tpu.memory_space<vmem>>, vector<1x128x128xf32>
    %28 = vector.shape_cast %27 : vector<1x128x128xf32> to vector<128x128xf32>
    %cst_13 = arith.constant dense<0.000000e+00> : vector<32x128xf32>
    %29 = tpu.matmul %26, %28, %cst_13 {dimension_numbers = #tpu.dot_dimension_numbers<[1], [0], [0], [1], [0, 0, 1, 1], [], []>} : vector<32x128xf32>, vector<128x128xf32>, vector<32x128xf32> -> vector<32x128xf32>
    %30 = vector.broadcast %3 : vector<1x128xf32> to vector<32x128xf32>
    %31 = arith.addf %29, %30 : vector<32x128xf32>
    %cst_14 = arith.constant 0.000000e+00 : f32
    %32 = vector.broadcast %cst_14 : f32 to vector<32x128xf32>
    %33 = arith.cmpf ogt, %31, %32 : vector<32x128xf32>
    %cst_15 = arith.constant 2.000000e-01 : f32
    %34 = vector.broadcast %cst_15 : f32 to vector<32x128xf32>
    %35 = arith.mulf %34, %31 : vector<32x128xf32>
    %36 = arith.select %33, %31, %35 : vector<32x128xi1>, vector<32x128xf32>
    %37 = vector.shape_cast %36 : vector<32x128xf32> to vector<2x16x128xf32>
    "tpu.trace_start"() <{level = 10 : i32, message = "bij,bjf->bif"}> : () -> ()
    %cst_16 = arith.constant dense<0.000000e+00> : vector<2x16x128xf32>
    %38 = tpu.matmul %15, %37, %cst_16 {dimension_numbers = #tpu.dot_dimension_numbers<[2], [1], [1], [2], [0, 0, 0, 1, 1, 2], [0], [0]>} : vector<2x16x16xf32>, vector<2x16x128xf32>, vector<2x16x128xf32> -> vector<2x16x128xf32>
    "tpu.trace_stop"() : () -> ()
    %39 = arith.addf %37, %38 : vector<2x16x128xf32>
    %40 = vector.shape_cast %39 : vector<2x16x128xf32> to vector<32x128xf32>
    %c1 = arith.constant 1 : index
    %c0_17 = arith.constant 0 : index
    %c0_18 = arith.constant 0 : index
    %41 = vector.load %arg3[%c1, %c0_17, %c0_18] : memref<10x128x128xf32, #tpu.memory_space<vmem>>, vector<1x128x128xf32>
    %42 = vector.shape_cast %41 : vector<1x128x128xf32> to vector<128x128xf32>
    %cst_19 = arith.constant dense<0.000000e+00> : vector<32x128xf32>
    %43 = tpu.matmul %40, %42, %cst_19 {dimension_numbers = #tpu.dot_dimension_numbers<[1], [0], [0], [1], [0, 0, 1, 1], [], []>} : vector<32x128xf32>, vector<128x128xf32>, vector<32x128xf32> -> vector<32x128xf32>
    %44 = vector.broadcast %4 : vector<1x128xf32> to vector<32x128xf32>
    %45 = arith.addf %43, %44 : vector<32x128xf32>
    %cst_20 = arith.constant 0.000000e+00 : f32
    %46 = vector.broadcast %cst_20 : f32 to vector<32x128xf32>
    %47 = arith.cmpf ogt, %45, %46 : vector<32x128xf32>
    %cst_21 = arith.constant 2.000000e-01 : f32
    %48 = vector.broadcast %cst_21 : f32 to vector<32x128xf32>
    %49 = arith.mulf %48, %45 : vector<32x128xf32>
    %50 = arith.select %47, %45, %49 : vector<32x128xi1>, vector<32x128xf32>
    %c2 = arith.constant 2 : index
    %c0_22 = arith.constant 0 : index
    %c0_23 = arith.constant 0 : index
    %51 = vector.load %arg3[%c2, %c0_22, %c0_23] : memref<10x128x128xf32, #tpu.memory_space<vmem>>, vector<1x128x128xf32>
    %52 = vector.shape_cast %51 : vector<1x128x128xf32> to vector<128x128xf32>
    %cst_24 = arith.constant dense<0.000000e+00> : vector<32x128xf32>
    %53 = tpu.matmul %50, %52, %cst_24 {dimension_numbers = #tpu.dot_dimension_numbers<[1], [0], [0], [1], [0, 0, 1, 1], [], []>} : vector<32x128xf32>, vector<128x128xf32>, vector<32x128xf32> -> vector<32x128xf32>
    %54 = vector.broadcast %5 : vector<1x128xf32> to vector<32x128xf32>
    %55 = arith.addf %53, %54 : vector<32x128xf32>
    %cst_25 = arith.constant 0.000000e+00 : f32
    %56 = vector.broadcast %cst_25 : f32 to vector<32x128xf32>
    %57 = arith.cmpf ogt, %55, %56 : vector<32x128xf32>
    %cst_26 = arith.constant 2.000000e-01 : f32
    %58 = vector.broadcast %cst_26 : f32 to vector<32x128xf32>
    %59 = arith.mulf %58, %55 : vector<32x128xf32>
    %60 = arith.select %57, %55, %59 : vector<32x128xi1>, vector<32x128xf32>
    %61 = vector.shape_cast %60 : vector<32x128xf32> to vector<2x16x128xf32>
    %cst_27 = arith.constant dense<0.000000e+00> : vector<2x128xf32>
    %62 = vector.multi_reduction <add>, %61, %cst_27 [1] : vector<2x16x128xf32> to vector<2x128xf32>
    %c3 = arith.constant 3 : index
    %c0_28 = arith.constant 0 : index
    %c0_29 = arith.constant 0 : index
    %63 = vector.load %arg3[%c3, %c0_28, %c0_29] : memref<10x128x128xf32, #tpu.memory_space<vmem>>, vector<1x128x128xf32>
    %64 = vector.shape_cast %63 : vector<1x128x128xf32> to vector<128x128xf32>
    %cst_30 = arith.constant dense<0.000000e+00> : vector<2x128xf32>
    %65 = tpu.matmul %62, %64, %cst_30 {dimension_numbers = #tpu.dot_dimension_numbers<[1], [0], [0], [1], [0, 0, 1, 1], [], []>} : vector<2x128xf32>, vector<128x128xf32>, vector<2x128xf32> -> vector<2x128xf32>
    %66 = vector.broadcast %6 : vector<1x128xf32> to vector<2x128xf32>
    %67 = arith.addf %65, %66 : vector<2x128xf32>
    %c4 = arith.constant 4 : index
    %c0_31 = arith.constant 0 : index
    %c0_32 = arith.constant 0 : index
    %68 = vector.load %arg3[%c4, %c0_31, %c0_32] : memref<10x128x128xf32, #tpu.memory_space<vmem>>, vector<1x128x128xf32>
    %69 = vector.shape_cast %68 : vector<1x128x128xf32> to vector<128x128xf32>
    %cst_33 = arith.constant dense<0.000000e+00> : vector<2x128xf32>
    %70 = tpu.matmul %67, %69, %cst_33 {dimension_numbers = #tpu.dot_dimension_numbers<[1], [0], [0], [1], [0, 0, 1, 1], [], []>} : vector<2x128xf32>, vector<128x128xf32>, vector<2x128xf32> -> vector<2x128xf32>
    %71 = vector.broadcast %7 : vector<1x128xf32> to vector<2x128xf32>
    %72 = arith.addf %70, %71 : vector<2x128xf32>
    %c5 = arith.constant 5 : index
    %c0_34 = arith.constant 0 : index
    %c0_35 = arith.constant 0 : index
    %73 = vector.load %arg3[%c5, %c0_34, %c0_35] : memref<10x128x128xf32, #tpu.memory_space<vmem>>, vector<1x128x128xf32>
    %74 = vector.shape_cast %73 : vector<1x128x128xf32> to vector<128x128xf32>
    %cst_36 = arith.constant dense<0.000000e+00> : vector<2x128xf32>
    %75 = tpu.matmul %67, %74, %cst_36 {dimension_numbers = #tpu.dot_dimension_numbers<[1], [0], [0], [1], [0, 0, 1, 1], [], []>} : vector<2x128xf32>, vector<128x128xf32>, vector<2x128xf32> -> vector<2x128xf32>
    %76 = vector.broadcast %8 : vector<1x128xf32> to vector<2x128xf32>
    %77 = arith.addf %75, %76 : vector<2x128xf32>
    %c0_37 = arith.constant 0 : index
    %c0_38 = arith.constant 0 : index
    %78 = vector.load %arg2[%c0_37, %c0_38] : memref<2x512xf32, #tpu.memory_space<vmem>>, vector<2x512xf32>
    %79 = vector.extract_strided_slice %78 {offsets = [0, 0], sizes = [2, 128], strides = [1, 1]} : vector<2x512xf32> to vector<2x128xf32>
    %80 = vector.extract_strided_slice %78 {offsets = [0, 128], sizes = [2, 128], strides = [1, 1]} : vector<2x512xf32> to vector<2x128xf32>
    %81 = vector.extract_strided_slice %78 {offsets = [0, 256], sizes = [2, 128], strides = [1, 1]} : vector<2x512xf32> to vector<2x128xf32>
    %82 = vector.extract_strided_slice %78 {offsets = [0, 384], sizes = [2, 128], strides = [1, 1]} : vector<2x512xf32> to vector<2x128xf32>
    %cst_39 = arith.constant 5.000000e-01 : f32
    %83 = vector.broadcast %cst_39 : f32 to vector<2x128xf32>
    %84 = arith.mulf %83, %77 : vector<2x128xf32>
    %85 = math.exp %84 : vector<2x128xf32>
    %86 = arith.mulf %80, %85 : vector<2x128xf32>
    %87 = arith.addf %72, %86 : vector<2x128xf32>
    %88 = vector.broadcast %12 : vector<1x128xf32> to vector<2x128xf32>
    %89 = arith.subf %79, %88 : vector<2x128xf32>
    %90 = vector.broadcast %13 : vector<1x128xf32> to vector<2x128xf32>
    %91 = arith.mulf %89, %90 : vector<2x128xf32>
    %cst_40 = arith.constant 1.000000e-01 : f32
    %92 = vector.broadcast %cst_40 : f32 to vector<2x128xf32>
    %93 = arith.mulf %92, %81 : vector<2x128xf32>
    %94 = arith.addf %91, %93 : vector<2x128xf32>
    %c6 = arith.constant 6 : index
    %c0_41 = arith.constant 0 : index
    %c0_42 = arith.constant 0 : index
    %95 = vector.load %arg3[%c6, %c0_41, %c0_42] : memref<10x128x128xf32, #tpu.memory_space<vmem>>, vector<1x128x128xf32>
    %96 = vector.shape_cast %95 : vector<1x128x128xf32> to vector<128x128xf32>
    %cst_43 = arith.constant dense<0.000000e+00> : vector<2x128xf32>
    %97 = tpu.matmul %87, %96, %cst_43 {dimension_numbers = #tpu.dot_dimension_numbers<[1], [0], [0], [1], [0, 0, 1, 1], [], []>} : vector<2x128xf32>, vector<128x128xf32>, vector<2x128xf32> -> vector<2x128xf32>
    %c7 = arith.constant 7 : index
    %c0_44 = arith.constant 0 : index
    %c0_45 = arith.constant 0 : index
    %98 = vector.load %arg3[%c7, %c0_44, %c0_45] : memref<10x128x128xf32, #tpu.memory_space<vmem>>, vector<1x128x128xf32>
    %99 = vector.shape_cast %98 : vector<1x128x128xf32> to vector<128x128xf32>
    %cst_46 = arith.constant dense<0.000000e+00> : vector<2x128xf32>
    %100 = tpu.matmul %94, %99, %cst_46 {dimension_numbers = #tpu.dot_dimension_numbers<[1], [0], [0], [1], [0, 0, 1, 1], [], []>} : vector<2x128xf32>, vector<128x128xf32>, vector<2x128xf32> -> vector<2x128xf32>
    %101 = arith.addf %97, %100 : vector<2x128xf32>
    %102 = vector.broadcast %9 : vector<1x128xf32> to vector<2x128xf32>
    %103 = arith.addf %101, %102 : vector<2x128xf32>
    %cst_47 = arith.constant 0.000000e+00 : f32
    %104 = vector.broadcast %cst_47 : f32 to vector<2x128xf32>
    %105 = arith.maximumf %103, %104 : vector<2x128xf32>
    %c8 = arith.constant 8 : index
    %c0_48 = arith.constant 0 : index
    %c0_49 = arith.constant 0 : index
    %106 = vector.load %arg3[%c8, %c0_48, %c0_49] : memref<10x128x128xf32, #tpu.memory_space<vmem>>, vector<1x128x128xf32>
    %107 = vector.shape_cast %106 : vector<1x128x128xf32> to vector<128x128xf32>
    %cst_50 = arith.constant dense<0.000000e+00> : vector<2x128xf32>
    %108 = tpu.matmul %105, %107, %cst_50 {dimension_numbers = #tpu.dot_dimension_numbers<[1], [0], [0], [1], [0, 0, 1, 1], [], []>} : vector<2x128xf32>, vector<128x128xf32>, vector<2x128xf32> -> vector<2x128xf32>
    %109 = vector.broadcast %10 : vector<1x128xf32> to vector<2x128xf32>
    %110 = arith.addf %108, %109 : vector<2x128xf32>
    %cst_51 = arith.constant 0.000000e+00 : f32
    %111 = vector.broadcast %cst_51 : f32 to vector<2x128xf32>
    %112 = arith.maximumf %110, %111 : vector<2x128xf32>
    %c9 = arith.constant 9 : index
    %c0_52 = arith.constant 0 : index
    %c0_53 = arith.constant 0 : index
    %113 = vector.load %arg3[%c9, %c0_52, %c0_53] : memref<10x128x128xf32, #tpu.memory_space<vmem>>, vector<1x128x128xf32>
    %114 = vector.shape_cast %113 : vector<1x128x128xf32> to vector<128x128xf32>
    %cst_54 = arith.constant dense<0.000000e+00> : vector<2x128xf32>
    %115 = tpu.matmul %112, %114, %cst_54 {dimension_numbers = #tpu.dot_dimension_numbers<[1], [0], [0], [1], [0, 0, 1, 1], [], []>} : vector<2x128xf32>, vector<128x128xf32>, vector<2x128xf32> -> vector<2x128xf32>
    %116 = vector.broadcast %11 : vector<1x128xf32> to vector<2x128xf32>
    %117 = arith.addf %115, %116 : vector<2x128xf32>
    %118 = arith.addf %117, %82 : vector<2x128xf32>
    %cst_55 = arith.constant 0.000000e+00 : f32
    %119 = vector.broadcast %cst_55 : f32 to vector<2x128xf32>
    %120 = arith.cmpf oge, %118, %119 : vector<2x128xf32>
    %cst_56 = arith.constant 1.000000e+00 : f32
    %cst_57 = arith.constant 0.000000e+00 : f32
    %121 = vector.broadcast %cst_56 : f32 to vector<2x128xf32>
    %122 = vector.broadcast %cst_57 : f32 to vector<2x128xf32>
    %123 = arith.select %120, %121, %122 : vector<2x128xi1>, vector<2x128xf32>
    %c0_58 = arith.constant 0 : index
    %c0_59 = arith.constant 0 : index
    %124 = vector.load %arg5[%c0_58, %c0_59] : memref<128x256xf32, #tpu.memory_space<vmem>>, vector<128x256xf32>
    %cst_60 = arith.constant dense<0.000000e+00> : vector<2x256xf32>
    %125 = tpu.matmul %123, %124, %cst_60 {dimension_numbers = #tpu.dot_dimension_numbers<[1], [0], [0], [1], [0, 0, 1, 1], [], []>} : vector<2x128xf32>, vector<128x256xf32>, vector<2x256xf32> -> vector<2x256xf32>
    %c0_61 = arith.constant 0 : index
    %c0_62 = arith.constant 0 : index
    %126 = vector.load %arg6[%c0_61, %c0_62] : memref<2x256xf32, #tpu.memory_space<vmem>>, vector<2x256xf32>
    tpu.vector_store %arg6[%c0_61, %c0_62], %125 {strides = array<i32>} : memref<2x256xf32, #tpu.memory_space<vmem>>, vector<2x256xf32>,
    return
  }
}

</mosaic_0001>

<bundles_post_ra>
// kernel: forward.3
= control target key start
LH: loop header
LB: loop body
LE: loop exit
PB: predicated region body
PF: predicated region fallthrough
CT: control target
= control target key end

     0   :  { %11 = vsyncpa [#allocation3], 0  ;;  %s2994_s0 = inlined_call_operand.vmem [shape: f32[2,16,8], index: 0, kind: input, shape index: {}]   ;;  %s2995_s1 = inlined_call_operand.vmem [shape: f32[2,16,16], index: 1, kind: input, shape index: {}]   ;;  %s2996_s2 = inlined_call_operand.vmem [shape: f32[2,512], index: 2, kind: input, shape index: {}]   ;;  %s2997_s3 = inlined_call_operand.hbm [shape: f32[10,128,128], index: 3, kind: input, shape index: {}]   ;;  %s2998_s4 = inlined_call_operand.hbm [shape: f32[32,128], index: 4, kind: input, shape index: {}]   ;;  %s2999_s5 = inlined_call_operand.vmem [shape: f32[128,256], index: 5, kind: input, shape index: {}]   ;;  %s3000_s6 = inlined_call_operand.vmem [shape: f32[2,256], index: 6, kind: output, shape index: {}]  }
   0x1   :  { %12 = vsyncpa [#allocation5], 0  ;;  %s2644_s21 = smov [#allocation2]   ;;  %s2596_s25 = scalar_lea.hbm %s2997_s3, 20480 }
   0x2   :  { %s24_s22 = sshll.u32 %s2644_s21, 4  ;;  %p2597_p0 = scmp.ne.s32.totalorder %s2997_s3, %s2596_s25  ;;  %s25_s22 = int_to_ptr.vmem [resolvable:$true] %s24_s22 }
   0x3   :  { %p2600_p1 = scmp.lt.u32.totalorder %s2596_s25, %s2997_s3 }
   0x5   :  { %p2602_p2 = pnand %p2600_p1, %p2597_p0 }
   0x7   :  { %2605 = shalt.err (!%p2602_p2)
}
   0x8   :  { %s2606_s30 = scalar_lea.vmem %s25_s22, 20480  ;;  %p2611_p4 = scmp.lt.s32.totalorder %s25_s22, %s25_s22 }
   0x9   :  { %p2607_p3 = scmp.ne.s32.totalorder %s25_s22, %s2606_s30  ;;  %p2612_p5 = scmp.lt.s32.totalorder %s2606_s30, %s2606_s30 }
   0xb   :  { %p2613_p6 = por %p2612_p5, %p2611_p4 }
   0xd   :  { %p2614_p7 = pnand %p2613_p6, %p2607_p3 }
   0xf   :  { %2617 = shalt.err (!%p2614_p7)
}
  0x10   :  { %s2645_s7 = smov 128   ;;  %s2646_s8 = smov 8  }
  0x11   :  { %30 = dma.hbm_to_vmem [thread:$0]  %s2997_s3, 20480, %s25_s22, [#allocation3], %s2645_s7, %s2645_s7, %s2646_s8  }
  0x12   :  { %s2647_s11 = smov [#allocation4]   ;;  %s2618_s15 = scalar_lea.hbm %s2998_s4, 512 }
  0x13   :  { %s36_s12 = sshll.u32 %s2647_s11, 4  ;;  %p2619_p8 = scmp.ne.s32.totalorder %s2998_s4, %s2618_s15  ;;  %s37_s12 = int_to_ptr.vmem [resolvable:$true] %s36_s12 }
  0x14   :  { %p2622_p9 = scmp.lt.u32.totalorder %s2618_s15, %s2998_s4 }
  0x16   :  { %p2624_p10 = pnand %p2622_p9, %p2619_p8 }
  0x18   :  { %2627 = shalt.err (!%p2624_p10)
}
  0x19   :  { %s2628_s20 = scalar_lea.vmem %s37_s12, 512  ;;  %p2633_p12 = scmp.lt.s32.totalorder %s37_s12, %s37_s12 }
  0x1a   :  { %p2629_p11 = scmp.ne.s32.totalorder %s37_s12, %s2628_s20  ;;  %p2634_p13 = scmp.lt.s32.totalorder %s2628_s20, %s2628_s20 }
  0x1c   :  { %p2635_p0 = por %p2634_p13, %p2633_p12 }
  0x1e   :  { %p2636_p1 = pnand %p2635_p0, %p2629_p11 }
  0x20   :  { %2639 = shalt.err (!%p2636_p1)
}
  0x21   :  { %42 = dma.hbm_to_vmem [thread:$0]  %s2998_s4, 512, %s37_s12, [#allocation5], %s2645_s7, %s2645_s7, %s2646_s8  }
  0x22   :  { %2640 = dma.done.wait [#allocation3], 20480  }
  0x23   :  { %2641 = vsyncadd [#allocation3], 4294946816 }
  0x24   :  { %2642 = dma.done.wait [#allocation5], 512  }
  0x25   :  { %2643 = vsyncadd [#allocation5], 4294966784  ;;  %vm62_vm0 = vcmask 130048   ;;  %v54_v0 = vld [vmem:[%s2994_s0] sm:$0xff]  ;;  %v55_v1 = vld [vmem:[%s2994_s0 + $0x8] sm:$0xff]  ;;  %vm233_vm1 = vcmask 64512   ;;  %v229_v43 = vlaneseq }
  0x26   :  { %v58_v2 = vld [vmem:[%s2995_s1] sm:$0xff]  ;;  %v2271_v3 = vpack.c.bf16 %v55_v1, %v54_v0  ;;  %v56_v4 = vld [vmem:[%s2994_s0 + $0x10] sm:$0xff]  ;;  %v57_v5 = vld [vmem:[%s2994_s0 + $0x18] sm:$0xff]  ;;  %vm2649_vm14 = vmmov 0  }
  0x27   :  { %1880 = vmatprep.mubr.msk.f32.mxu0 %vm62_vm0, %v58_v2  ;;  %v2275_v6 = vpack.c.bf16 %v57_v5, %v56_v4  ;;  %v2731_v7 = vld [vmem:[%s2995_s1 + $0x8] sm:$0xff]  ;;  %v2736_v8 = vld [vmem:[%s2995_s1 + $0x10] sm:$0xff]  ;;  %v2745_v9 = vld [vmem:[%s2995_s1 + $0x18] sm:$0xff]  ;;  %v2750_v44 = vshrl.u32 %v229_v43, 7 }
  0x28   :  { %2272 = vmatprep.subr.bf16.mxu0 %v2271_v3  ;;  %v51_v10 = vld [vmem:[#allocation4] sm:$0xff]  ;;  %v344_v12 = vld [vmem:[#allocation2 + $0x8] sm:$0xff]  ;;  %v345_v13 = vld [vmem:[#allocation2 + $0x10] sm:$0xff] }
  0x29   :  { %2274 = vmatpush3.bf16.msra.mxu0 %v2271_v3  ;;  %v343_v11 = vld [vmem:[#allocation2] sm:$0xff]  ;;  %v346_v15 = vld [vmem:[#allocation2 + $0x18] sm:$0xff]  ;;  %v348_v18 = vld [vmem:[#allocation2 + $0x28] sm:$0xff]  ;;  %v231_v45 = vsub.s32 0, %v2750_v44 }
  0x2a   :  { %2276 = vmatprep.subr.bf16.mxu0 %v2275_v6  ;;  %v2279_v14 = vpack.c.bf16 %v344_v12, %v343_v11  ;;  %v2283_v16 = vpack.c.bf16 %v346_v15, %v345_v13  ;;  %v347_v17 = vld [vmem:[#allocation2 + $0x20] sm:$0xff]  ;;  %v349_v20 = vld [vmem:[#allocation2 + $0x30] sm:$0xff]  ;;  %v350_v21 = vld [vmem:[#allocation2 + $0x38] sm:$0xff] }
  0x2b   :  { %v2287_v19 = vpack.c.bf16 %v348_v18, %v347_v17  ;;  %v2291_v22 = vpack.c.bf16 %v350_v21, %v349_v20  ;;  %v351_v23 = vld [vmem:[#allocation2 + $0x40] sm:$0xff]  ;;  %v352_v24 = vld [vmem:[#allocation2 + $0x48] sm:$0xff]  ;;  %v353_v26 = vld [vmem:[#allocation2 + $0x50] sm:$0xff] }
  0x2c   :  { %1881 = vmatmul.mubr.msk.f32.vlgmr.msra.gmra.mrb[0].mxu0 %vm62_vm0, %v2731_v7  ;;  %2280 = vmatprep.subr.bf16.mxu1 %v2279_v14  ;;  %v2295_v25 = vpack.c.bf16 %v352_v24, %v351_v23  ;;  %v354_v27 = vld [vmem:[#allocation2 + $0x58] sm:$0xff]  ;;  %v355_v37 = vld [vmem:[#allocation2 + $0x60] sm:$0xff]  ;;  %v356_v38 = vld [vmem:[#allocation2 + $0x68] sm:$0xff] }
  0x2d   :  { %2278 = vmatpush3.bf16.msra.mxu0 %v2275_v6  ;;  %1887 = vmatprep.mubr.msk.f32.mxu0 %vm62_vm0, %v2736_v8  ;;  %v2299_v28 = vpack.c.bf16 %v354_v27, %v353_v26  ;;  %v2303_v39 = vpack.c.bf16 %v356_v38, %v355_v37  ;;  %v357_v40 = vld [vmem:[#allocation2 + $0x70] sm:$0xff]  ;;  %v358_v41 = vld [vmem:[#allocation2 + $0x78] sm:$0xff]  ;;  %v2753_v46 = vld [vmem:[#allocation4 + $0x8] sm:$0xff] }
  0x2e   :  { %1890 = vmatprep.subr.mxu0 %v51_v10  ;;  %2282 = vmatpush3.bf16.msra.mxu1 %v2279_v14  ;;  %v2307_v42 = vpack.c.bf16 %v358_v41, %v357_v40  ;;  %v232_v47 = vrot.slane %v2753_v46, %v231_v45  ;;  %v615_v20 = vld [vmem:[#allocation2 + $0x80] sm:$0xff]  ;;  %v616_v21 = vld [vmem:[#allocation2 + $0x88] sm:$0xff]  ;;  %v617_v26 = vld [vmem:[#allocation2 + $0x90] sm:$0xff] }
  0x2f   :  { %2284 = vmatprep.subr.bf16.mxu1 %v2283_v16  ;;  %v618_v27 = vld [vmem:[#allocation2 + $0x98] sm:$0xff]  ;;  %v629_v41 = vld [vmem:[#allocation2 + $0xf0] sm:$0xff] }
  0x30   :  { %1888 = vmatmul.mubr.msk.f32.vlgmr.msra.gmra.mrb[2].mxu0 %vm62_vm0, %v2745_v9  ;;  %v626_v37 = vld [vmem:[#allocation2 + $0xd8] sm:$0xff] }
  0x31   :  { %1891 = vmatpush3.msra.mxu0 %v51_v10 }
  0x32   :  { %2286 = vmatpush3.bf16.msra.mxu1 %v2283_v16 }
  0x33   :  { %2288 = vmatprep.subr.bf16.mxu1 %v2287_v19 }
  0x36   :  { %2290 = vmatpush3.bf16.msra.mxu1 %v2287_v19 }
  0x37   :  { %2292 = vmatprep.subr.bf16.mxu1 %v2291_v22 }
  0x3a   :  { %2294 = vmatpush3.bf16.msra.mxu1 %v2291_v22 }
  0x3b   :  { %2296 = vmatprep.subr.bf16.mxu1 %v2295_v25 }
  0x3e   :  { %2298 = vmatpush3.bf16.msra.mxu1 %v2295_v25  ;;  %v2319_v25 = vpack.c.bf16 %v616_v21, %v615_v20  ;;  %v866_v20 = vld [vmem:[#allocation2 + $0x188] sm:$0xff]  ;;  %v867_v21 = vld [vmem:[#allocation2 + $0x190] sm:$0xff] }
  0x3f   :  { %2300 = vmatprep.subr.bf16.mxu1 %v2299_v28 }
  0x42   :  { %2302 = vmatpush3.bf16.msra.mxu1 %v2299_v28  ;;  %v2323_v28 = vpack.c.bf16 %v618_v27, %v617_v26  ;;  %v633_v26 = vsub.s32 2, %v2750_v44 }
  0x43   :  { %2304 = vmatprep.subr.bf16.mxu1 %v2303_v39 }
  0x44   :  { %v634_v27 = vrot.slane %v2753_v46, %v633_v26 }
  0x46   :  { %2306 = vmatpush3.bf16.msra.mxu1 %v2303_v39  ;;  %v627_v39 = vld [vmem:[#allocation2 + $0xe0] sm:$0xff] }
  0x47   :  { %2308 = vmatprep.subr.bf16.mxu1 %v2307_v42 }
  0x4a   :  { %2310 = vmatpush3.bf16.msra.mxu1 %v2307_v42  ;;  %v630_v42 = vld [vmem:[#allocation2 + $0xf8] sm:$0xff] }
  0x4b   :  { %v2347_v43 = vpack.c.bf16 %v630_v42, %v629_v41  ;;  %v869_v41 = vld [vmem:[#allocation2 + $0x1a0] sm:$0xff]  ;;  %v870_v42 = vld [vmem:[#allocation2 + $0x1a8] sm:$0xff] }
  0xff   :  { %v1882_v29 = vpop.f32.mrb[0].mxu0 }
 0x100   :  { %v135_v30 = vpop.f32.mrb[1].mxu0  ;;  %v226_v32 = vadd.f32 %v1882_v29, %v55_v1  ;;  %v619_v29 = vld [vmem:[#allocation2 + $0xa0] sm:$0xff] }
 0x101   :  { %v225_v31 = vadd.f32 %v135_v30, %v54_v0  ;;  %v361_v0 = vsub.s32 1, %v2750_v44  ;;  %v620_v30 = vld [vmem:[#allocation2 + $0xa8] sm:$0xff] }
 0x103   :  { %v1889_v33 = vpop.f32.mrb[2].mxu0  ;;  %1892 = vmatprep.mubr.msk.f32.mxu0 %vm233_vm1, %v225_v31  ;;  %v362_v1 = vrot.slane %v2753_v46, %v361_v0  ;;  %v2327_v31 = vpack.c.bf16 %v620_v30, %v619_v29 }
 0x104   :  { %v216_v34 = vpop.f32.mrb[3].mxu0  ;;  %1893 = vmatmul.mubr.msk.f32.vlgmr.msra.gmra.mrb[4].mxu0 %vm233_vm1, %v226_v32  ;;  %v228_v36 = vadd.f32 %v1889_v33, %v57_v5  ;;  %v621_v32 = vld [vmem:[#allocation2 + $0xb0] sm:$0xff]  ;;  %v622_v33 = vld [vmem:[#allocation2 + $0xb8] sm:$0xff] }
 0x105   :  { %v227_v35 = vadd.f32 %v216_v34, %v56_v4  ;;  %v623_v34 = vld [vmem:[#allocation2 + $0xc0] sm:$0xff] }
 0x107   :  { %1895 = vmatprep.mubr.msk.f32.mxu0 %vm233_vm1, %v227_v35  ;;  %v624_v35 = vld [vmem:[#allocation2 + $0xc8] sm:$0xff] }
 0x108   :  { %1896 = vmatmul.mubr.msk.f32.gmra.mrb[6].mxu0 %vm233_vm1, %v228_v36  ;;  %v625_v36 = vld [vmem:[#allocation2 + $0xd0] sm:$0xff] }
 0x109   :  { %1940 = vmatprep.mubr.msk.f32.mxu0 %vm62_vm0, %v58_v2  ;;  %v2339_v38 = vpack.c.bf16 %v626_v37, %v625_v36 }
 0x1d7   :  { %v1894_v48 = vpop.f32.mrb[4].mxu0 }
 0x1d8   :  { %v318_v49 = vadd.f32 %v1894_v48, %v232_v47  ;;  %v312_v50 = vpop.f32.mrb[5].mxu0  ;;  %v734_v48 = vld [vmem:[#allocation2 + $0x108] sm:$0xff] }
 0x1d9   :  { %v313_v51 = vadd.f32 %v312_v50, %v232_v47 }
 0x1da   :  { %v336_v52 = vmul.f32 0.2, %v318_v49  ;;  %vm332_vm3 = vcmp.gt.f32.partialorder %v318_v49, 0.0 }
 0x1db   :  { %v1897_v53 = vpop.f32.mrb[6].mxu0  ;;  %vm331_vm2 = vcmp.gt.f32.partialorder %v313_v51, 0.0  ;;  %v335_v54 = vmul.f32 0.2, %v313_v51 }
 0x1dc   :  { %v328_v55 = vadd.f32 %v1897_v53, %v232_v47  ;;  %v322_v56 = vpop.f32.mrb[7].mxu0  ;;  %v340_v60 = vsel %vm332_vm3, %v318_v49, %v336_v52  ;;  %v735_v49 = vld [vmem:[#allocation2 + $0x110] sm:$0xff]  ;;  %v737_v53 = vld [vmem:[#allocation2 + $0x120] sm:$0xff]  ;;  %vm887_vm3 = vcmask 1041409  }
 0x1dd   :  { %v323_v57 = vadd.f32 %v322_v56, %v232_v47  ;;  %v339_v58 = vsel %vm331_vm2, %v313_v51, %v335_v54  ;;  %v733_v47 = vld [vmem:[#allocation2 + $0x100] sm:$0xff]  ;;  %v736_v51 = vld [vmem:[#allocation2 + $0x118] sm:$0xff]  ;;  %v738_v54 = vld [vmem:[#allocation2 + $0x128] sm:$0xff] }
 0x1de   :  { %v338_v59 = vmul.f32 0.2, %v328_v55  ;;  %1930 = vmatprep.mubr.f32.mxu1 %v339_v58  ;;  %vm334_vm5 = vcmp.gt.f32.partialorder %v328_v55, 0.0  ;;  %v2351_v50 = vpack.c.bf16 %v734_v48, %v733_v47  ;;  %v2355_v52 = vpack.c.bf16 %v736_v51, %v735_v49  ;;  %v739_v56 = vld [vmem:[#allocation2 + $0x130] sm:$0xff]  ;;  %v872_v48 = vld [vmem:[#allocation2 + $0x1b8] sm:$0xff]  ;;  %v874_v51 = vld [vmem:[#allocation2 + $0x1c8] sm:$0xff] }
 0x1df   :  { %v337_v61 = vmul.f32 0.2, %v323_v57  ;;  %1931 = vmatmul.mubr.f32.vlgmr.msra.gmra.mrb[0].mxu1 %v340_v60  ;;  %vm333_vm4 = vcmp.gt.f32.partialorder %v323_v57, 0.0  ;;  %v742_v60 = vld [vmem:[#allocation2 + $0x148] sm:$0xff]  ;;  %v871_v47 = vld [vmem:[#allocation2 + $0x1b0] sm:$0xff] }
 0x1e0   :  { %v342_v63 = vsel %vm334_vm5, %v328_v55, %v338_v59  ;;  %2352 = vmatprep.subr.bf16.mxu1 %v2351_v50  ;;  %v2359_v55 = vpack.c.bf16 %v738_v54, %v737_v53  ;;  %v741_v59 = vld [vmem:[#allocation2 + $0x140] sm:$0xff]  ;;  %v2393_v49 = vpack.c.bf16 %v872_v48, %v871_v47  ;;  %v875_v53 = vld [vmem:[#allocation2 + $0x1d0] sm:$0xff]  ;;  %v876_v54 = vld [vmem:[#allocation2 + $0x1d8] sm:$0xff] }
 0x1e1   :  { %v341_v62 = vsel %vm333_vm4, %v323_v57, %v337_v61  ;;  %2354 = vmatpush3.bf16.msra.mxu1 %v2351_v50  ;;  %v740_v57 = vld [vmem:[#allocation2 + $0x138] sm:$0xff]  ;;  %v2367_v61 = vpack.c.bf16 %v742_v60, %v741_v59  ;;  %v873_v50 = vld [vmem:[#allocation2 + $0x1c0] sm:$0xff]  ;;  %v879_v59 = vld [vmem:[#allocation2 + $0x1f0] sm:$0xff] }
 0x1e2   :  { %1933 = vmatprep.mubr.f32.mxu1 %v341_v62  ;;  %2356 = vmatprep.subr.bf16.mxu1 %v2355_v52  ;;  %v2363_v58 = vpack.c.bf16 %v740_v57, %v739_v56  ;;  %v743_v62 = vld [vmem:[#allocation2 + $0x150] sm:$0xff]  ;;  %v877_v56 = vld [vmem:[#allocation2 + $0x1e0] sm:$0xff]  ;;  %v878_v57 = vld [vmem:[#allocation2 + $0x1e8] sm:$0xff] }
 0x1e3   :  { %1934 = vmatmul.mubr.f32.gmra.mrb[2].mxu1 %v342_v63  ;;  %v744_v63 = vld [vmem:[#allocation2 + $0x158] sm:$0xff] }
 0x1e4   :  { %v880_v60 = vld [vmem:[#allocation2 + $0x1f8] sm:$0xff] }
 0x1e5   :  { %2358 = vmatpush3.bf16.msra.mxu1 %v2355_v52  ;;  %v2396_v52 = vpack.c.bf16 %v874_v51, %v873_v50 }
 0x1e6   :  { %2360 = vmatprep.subr.bf16.mxu1 %v2359_v55 }
 0x1e9   :  { %2362 = vmatpush3.bf16.msra.mxu1 %v2359_v55  ;;  %v2399_v55 = vpack.c.bf16 %v876_v54, %v875_v53 }
 0x1ea   :  { %2364 = vmatprep.subr.bf16.mxu1 %v2363_v58 }
 0x1ed   :  { %2366 = vmatpush3.bf16.msra.mxu1 %v2363_v58  ;;  %v2402_v58 = vpack.c.bf16 %v878_v57, %v877_v56  ;;  %v1053_v56 = vld [vmem:[#allocation2 + $0x288] sm:$0xff] }
 0x1ee   :  { %2368 = vmatprep.subr.bf16.mxu1 %v2367_v61 }
 0x1f1   :  { %2370 = vmatpush3.bf16.msra.mxu1 %v2367_v61  ;;  %v2405_v61 = vpack.c.bf16 %v880_v60, %v879_v59 }
 0x2b2   :  { %v1932_v2 = vpop.f32.mrb[0].mxu1 }
 0x2b3   :  { %v435_v3 = vadd.f32 %v1932_v2, %v362_v1  ;;  %v429_v4 = vpop.f32.mrb[1].mxu1 }
 0x2b4   :  { %v430_v5 = vadd.f32 %v429_v4, %v362_v1 }
 0x2b5   :  { %vm449_vm6 = vcmp.gt.f32.partialorder %v435_v3, 0.0  ;;  %v453_v6 = vmul.f32 0.2, %v435_v3 }
 0x2b6   :  { %vm448_vm7 = vcmp.gt.f32.partialorder %v430_v5, 0.0  ;;  %v452_v10 = vmul.f32 0.2, %v430_v5  ;;  %v1935_v11 = vpop.f32.mrb[2].mxu1 }
 0x2b7   :  { %v445_v12 = vadd.f32 %v1935_v11, %v362_v1  ;;  %v439_v13 = vpop.f32.mrb[3].mxu1  ;;  %v2762_v14 = vsel %vm449_vm6, %v435_v3, %v453_v6 }
 0x2b8   :  { %v440_v15 = vadd.f32 %v439_v13, %v362_v1  ;;  %v2764_v16 = vsel %vm448_vm7, %v430_v5, %v452_v10  ;;  %v2371_v1 = vpack.c.bf16 %v744_v63, %v743_v62  ;;  %v745_v13 = vld [vmem:[#allocation2 + $0x160] sm:$0xff]  ;;  %v2650_v62 = vmov 0.0  }
 0x2b9   :  { %vm451_vm8 = vcmp.gt.f32.partialorder %v445_v12, 0.0  ;;  %v455_v17 = vmul.f32 0.2, %v445_v12  ;;  %v2311_v18 = vpack.c.bf16 %v2762_v14, %v2764_v16  ;;  %v961_v63 = vld [vmem:[#allocation2 + $0x200] sm:$0xff] }
 0x2ba   :  { %vm450_vm9 = vcmp.gt.f32.partialorder %v440_v15, 0.0  ;;  %v454_v19 = vmul.f32 0.2, %v440_v15  ;;  %2372 = vmatprep.subr.bf16.mxu1 %v2371_v1 }
 0x2bb   :  { %2312 = vmatprep.subr.bf16.mxu0 %v2311_v18  ;;  %v2768_v22 = vsel %vm451_vm8, %v445_v12, %v455_v17  ;;  %2374 = vmatpush3.bf16.msra.mxu1 %v2371_v1  ;;  %v962_v1 = vld [vmem:[#allocation2 + $0x208] sm:$0xff] }
 0x2bc   :  { %2314 = vmatpush3.bf16.msra.mxu0 %v2311_v18  ;;  %v2770_v23 = vsel %vm450_vm9, %v440_v15, %v454_v19  ;;  %v746_v15 = vld [vmem:[#allocation2 + $0x168] sm:$0xff]  ;;  %v747_v18 = vld [vmem:[#allocation2 + $0x170] sm:$0xff]  ;;  %v748_v19 = vld [vmem:[#allocation2 + $0x178] sm:$0xff] }
 0x2bd   :  { %v2315_v24 = vpack.c.bf16 %v2768_v22, %v2770_v23  ;;  %v2375_v17 = vpack.c.bf16 %v746_v15, %v745_v13  ;;  %v968_v13 = vld [vmem:[#allocation2 + $0x238] sm:$0xff] }
 0x2bf   :  { %1941 = vmatmul.mubr.msk.f32.vlgmr.msra.gmra.mrb[8].mxu0 %vm62_vm0, %v2731_v7  ;;  %2316 = vmatprep.subr.bf16.mxu0 %v2315_v24  ;;  %v2331_v7 = vpack.c.bf16 %v622_v33, %v621_v32 }
 0x2c0   :  { %2318 = vmatpush3.bf16.msra.mxu0 %v2315_v24  ;;  %1947 = vmatprep.mubr.msk.f32.mxu0 %vm62_vm0, %v2736_v8  ;;  %v2335_v8 = vpack.c.bf16 %v624_v35, %v623_v34  ;;  %v2648_v24 = vmov 0.0|0.0  }
 0x2c1   :  { %2320 = vmatprep.subr.bf16.mxu0 %v2319_v25  ;;  %2376 = vmatprep.subr.bf16.mxu1 %v2375_v17 }
 0x2c2   :  { %2378 = vmatpush3.bf16.msra.mxu1 %v2375_v17  ;;  %v969_v17 = vld [vmem:[#allocation2 + $0x240] sm:$0xff] }
 0x2c3   :  { %1948 = vmatmul.mubr.msk.f32.vlgmr.msra.gmra.mrb[10].mxu0 %vm62_vm0, %v2745_v9  ;;  %v628_v9 = vld [vmem:[#allocation2 + $0xe8] sm:$0xff] }
 0x2c4   :  { %2322 = vmatpush3.bf16.msra.mxu0 %v2319_v25  ;;  %v2343_v40 = vpack.c.bf16 %v628_v9, %v627_v39 }
 0x2c5   :  { %2324 = vmatprep.subr.bf16.mxu0 %v2323_v28 }
 0x2c8   :  { %2326 = vmatpush3.bf16.msra.mxu0 %v2323_v28 }
 0x2c9   :  { %2328 = vmatprep.subr.bf16.mxu0 %v2327_v31 }
 0x2cc   :  { %2330 = vmatpush3.bf16.msra.mxu0 %v2327_v31 }
 0x2cd   :  { %2332 = vmatprep.subr.bf16.mxu0 %v2331_v7 }
 0x2d0   :  { %2334 = vmatpush3.bf16.msra.mxu0 %v2331_v7 }
 0x2d1   :  { %2336 = vmatprep.subr.bf16.mxu0 %v2335_v8 }
 0x2d4   :  { %2338 = vmatpush3.bf16.msra.mxu0 %v2335_v8 }
 0x2d5   :  { %2340 = vmatprep.subr.bf16.mxu0 %v2339_v38 }
 0x2d8   :  { %2342 = vmatpush3.bf16.msra.mxu0 %v2339_v38 }
 0x2d9   :  { %2344 = vmatprep.subr.bf16.mxu0 %v2343_v40 }
 0x2dc   :  { %2346 = vmatpush3.bf16.msra.mxu0 %v2343_v40 }
 0x2dd   :  { %2348 = vmatprep.subr.bf16.mxu0 %v2347_v43 }
 0x2e0   :  { %2350 = vmatpush3.bf16.msra.mxu0 %v2347_v43  ;;  %v2390_v43 = vpack.c.bf16 %v870_v42, %v869_v41 }
 0x2e1   :  { %2383 = vmatprep.subr.bf16.mxu0 %v2648_v24 }
 0x392   :  { %v1942_v2 = vpop.f32.mrb[8].mxu0 }
 0x393   :  { %v526_v3 = vpop.f32.mrb[9].mxu0  ;;  %v611_v5 = vadd.f32 %v1942_v2, %v2762_v14  ;;  %v865_v14 = vld [vmem:[#allocation2 + $0x180] sm:$0xff]  ;;  %v2408_v2 = vpack.c.bf16 %v962_v1, %v961_v63  ;;  %v1055_v63 = vld [vmem:[#allocation2 + $0x298] sm:$0xff] }
 0x394   :  { %v610_v4 = vadd.f32 %v526_v3, %v2764_v16  ;;  %v2379_v16 = vpack.c.bf16 %v748_v19, %v747_v18  ;;  %v963_v3 = vld [vmem:[#allocation2 + $0x210] sm:$0xff]  ;;  %v970_v18 = vld [vmem:[#allocation2 + $0x248] sm:$0xff] }
 0x395   :  { %v2420_v19 = vpack.c.bf16 %v970_v18, %v969_v17  ;;  %v1062_v17 = vld [vmem:[#allocation2 + $0x2d0] sm:$0xff]  ;;  %v1063_v18 = vld [vmem:[#allocation2 + $0x2d8] sm:$0xff] }
 0x396   :  { %v1949_v6 = vpop.f32.mrb[10].mxu0  ;;  %1982 = vmatprep.mubr.f32.mxu0 %v610_v4  ;;  %2380 = vmatprep.subr.bf16.mxu1 %v2379_v16  ;;  %v964_v4 = vld [vmem:[#allocation2 + $0x218] sm:$0xff] }
 0x397   :  { %v601_v10 = vpop.f32.mrb[11].mxu0  ;;  %1983 = vmatmul.mubr.f32.vlgmr.msra.gmra.mrb[12].mxu0 %v611_v5  ;;  %v613_v12 = vadd.f32 %v1949_v6, %v2768_v22  ;;  %2382 = vmatpush3.bf16.msra.mxu1 %v2379_v16  ;;  %v868_v22 = vld [vmem:[#allocation2 + $0x198] sm:$0xff]  ;;  %v2411_v5 = vpack.c.bf16 %v964_v4, %v963_v3  ;;  %v965_v6 = vld [vmem:[#allocation2 + $0x220] sm:$0xff]  ;;  %v971_v16 = vld [vmem:[#allocation2 + $0x250] sm:$0xff] }
 0x398   :  { %v612_v11 = vadd.f32 %v601_v10, %v2770_v23  ;;  %v2384_v23 = vpack.c.bf16 %v866_v20, %v865_v14  ;;  %2407 = vmatprep.subr.bf16.mxu1 %v2648_v24  ;;  %v2387_v25 = vpack.c.bf16 %v868_v22, %v867_v21  ;;  %v966_v10 = vld [vmem:[#allocation2 + $0x228] sm:$0xff]  ;;  %v972_v14 = vld [vmem:[#allocation2 + $0x258] sm:$0xff]  ;;  %v973_v21 = vld [vmem:[#allocation2 + $0x260] sm:$0xff] }
 0x399   :  { %v2423_v20 = vpack.c.bf16 %v972_v14, %v971_v16  ;;  %v1056_v3 = vld [vmem:[#allocation2 + $0x2a0] sm:$0xff]  ;;  %v1057_v4 = vld [vmem:[#allocation2 + $0x2a8] sm:$0xff] }
 0x39a   :  { %1985 = vmatprep.mubr.f32.mxu0 %v612_v11  ;;  %2385 = vmatpush3.bf16.msra.mxu0 %v2384_v23  ;;  %v2414_v11 = vpack.c.bf16 %v966_v10, %v965_v6  ;;  %v974_v23 = vld [vmem:[#allocation2 + $0x268] sm:$0xff]  ;;  %v1058_v6 = vld [vmem:[#allocation2 + $0x2b0] sm:$0xff]  ;;  %v1059_v10 = vld [vmem:[#allocation2 + $0x2b8] sm:$0xff] }
 0x39b   :  { %1986 = vmatmul.mubr.f32.gmra.mrb[14].mxu0 %v613_v12  ;;  %2386 = vmatprep.subr.bf16.mxu0 %v2648_v24  ;;  %v967_v12 = vld [vmem:[#allocation2 + $0x230] sm:$0xff]  ;;  %v2426_v22 = vpack.c.bf16 %v974_v23, %v973_v21  ;;  %v1064_v16 = vld [vmem:[#allocation2 + $0x2e0] sm:$0xff]  ;;  %v1065_v14 = vld [vmem:[#allocation2 + $0x2e8] sm:$0xff] }
 0x39c   :  { %2058 = vmatprep.mubr.msk.f32.mxu0 %vm2649_vm14, %v2650_v62  ;;  %v2417_v15 = vpack.c.bf16 %v968_v13, %v967_v12  ;;  %v1060_v12 = vld [vmem:[#allocation2 + $0x2c0] sm:$0xff]  ;;  %v1061_v13 = vld [vmem:[#allocation2 + $0x2c8] sm:$0xff]  ;;  %v975_v21 = vld [vmem:[#allocation2 + $0x270] sm:$0xff] }
 0x39d   :  { %v976_v23 = vld [vmem:[#allocation2 + $0x278] sm:$0xff] }
 0x39e   :  { %2388 = vmatpush3.bf16.msra.mxu0 %v2387_v25  ;;  %v751_v25 = vsub.s32 3, %v2750_v44 }
 0x39f   :  { %2389 = vmatprep.subr.bf16.mxu0 %v2648_v24 }
 0x3a2   :  { %2391 = vmatpush3.bf16.msra.mxu0 %v2390_v43 }
 0x3a3   :  { %2392 = vmatprep.subr.bf16.mxu0 %v2648_v24 }
 0x3a6   :  { %2394 = vmatpush3.bf16.msra.mxu0 %v2393_v49 }
 0x3a7   :  { %2395 = vmatprep.subr.bf16.mxu0 %v2648_v24 }
 0x3aa   :  { %2397 = vmatpush3.bf16.msra.mxu0 %v2396_v52 }
 0x3ab   :  { %2398 = vmatprep.subr.bf16.mxu0 %v2648_v24 }
 0x3ae   :  { %2400 = vmatpush3.bf16.msra.mxu0 %v2399_v55  ;;  %v1052_v55 = vld [vmem:[#allocation2 + $0x280] sm:$0xff] }
 0x3af   :  { %2401 = vmatprep.subr.bf16.mxu0 %v2648_v24  ;;  %v2432_v60 = vpack.c.bf16 %v1053_v56, %v1052_v55  ;;  %v1172_v56 = vld [vmem:[#allocation2 + $0x330] sm:$0xff] }
 0x3b2   :  { %2403 = vmatpush3.bf16.msra.mxu0 %v2402_v58 }
 0x3b3   :  { %2404 = vmatprep.subr.bf16.mxu0 %v2648_v24 }
 0x3b6   :  { %2406 = vmatpush3.bf16.msra.mxu0 %v2405_v61  ;;  %v1054_v61 = vld [vmem:[#allocation2 + $0x290] sm:$0xff] }
 0x3b7   :  { %2431 = vmatprep.subr.bf16.mxu0 %v2648_v24 }
 0x46a   :  { %v1984_v28 = vpop.f32.mrb[12].mxu0 }
 0x46b   :  { %v707_v29 = vadd.f32 %v1984_v28, %v634_v27  ;;  %v701_v30 = vpop.f32.mrb[13].mxu0 }
 0x46c   :  { %v702_v31 = vadd.f32 %v701_v30, %v634_v27 }
 0x46d   :  { %v725_v32 = vmul.f32 0.2, %v707_v29  ;;  %vm721_vm10 = vcmp.gt.f32.partialorder %v707_v29, 0.0 }
 0x46e   :  { %v724_v33 = vmul.f32 0.2, %v702_v31  ;;  %v1987_v7 = vpop.f32.mrb[14].mxu0  ;;  %vm720_vm11 = vcmp.gt.f32.partialorder %v702_v31, 0.0 }
 0x46f   :  { %v717_v34 = vadd.f32 %v1987_v7, %v634_v27  ;;  %v711_v35 = vpop.f32.mrb[15].mxu0  ;;  %v729_v37 = vsel %vm721_vm10, %v707_v29, %v725_v32 }
 0x470   :  { %v712_v8 = vadd.f32 %v711_v35, %v634_v27  ;;  %v728_v36 = vsel %vm720_vm11, %v702_v31, %v724_v33  ;;  %v752_v27 = vrot.slane %v2753_v46, %v751_v25 }
 0x471   :  { %v727_v38 = vmul.f32 0.2, %v717_v34  ;;  %2020 = vmatprep.mubr.f32.mxu1 %v728_v36  ;;  %vm723_vm13 = vcmp.gt.f32.partialorder %v717_v34, 0.0 }
 0x472   :  { %v726_v39 = vmul.f32 0.2, %v712_v8  ;;  %2021 = vmatmul.mubr.f32.vlgmr.msra.gmra.mrb[4].mxu1 %v729_v37  ;;  %vm722_vm12 = vcmp.gt.f32.partialorder %v712_v8, 0.0 }
 0x473   :  { %v731_v40 = vsel %vm723_vm13, %v717_v34, %v727_v38  ;;  %2409 = vmatpush3.bf16.msra.mxu1 %v2408_v2  ;;  %v2435_v2 = vpack.c.bf16 %v1055_v63, %v1054_v61  ;;  %v1174_v63 = vld [vmem:[#allocation2 + $0x340] sm:$0xff] }
 0x474   :  { %v730_v9 = vsel %vm722_vm12, %v712_v8, %v726_v39  ;;  %2410 = vmatprep.subr.bf16.mxu1 %v2648_v24 }
 0x475   :  { %2023 = vmatprep.mubr.f32.mxu1 %v730_v9 }
 0x476   :  { %2024 = vmatmul.mubr.f32.gmra.mrb[6].mxu1 %v731_v40 }
 0x477   :  { %2093 = vmatprep.mubr.msk.f32.mxu1 %vm2649_vm14, %v2650_v62  ;;  %2412 = vmatpush3.bf16.msra.mxu1 %v2411_v5  ;;  %v2438_v5 = vpack.c.bf16 %v1057_v4, %v1056_v3  ;;  %v1193_v4 = vld [vmem:[#allocation2 + $0x3d0] sm:$0xff] }
 0x478   :  { %2413 = vmatprep.subr.bf16.mxu1 %v2648_v24 }
 0x47b   :  { %2415 = vmatpush3.bf16.msra.mxu1 %v2414_v11  ;;  %v2441_v11 = vpack.c.bf16 %v1059_v10, %v1058_v6  ;;  %v1176_v6 = vld [vmem:[#allocation2 + $0x350] sm:$0xff] }
 0x47c   :  { %2416 = vmatprep.subr.bf16.mxu1 %v2648_v24 }
 0x47f   :  { %2418 = vmatpush3.bf16.msra.mxu1 %v2417_v15  ;;  %v2444_v15 = vpack.c.bf16 %v1061_v13, %v1060_v12  ;;  %v1177_v12 = vld [vmem:[#allocation2 + $0x358] sm:$0xff]  ;;  %v1195_v13 = vld [vmem:[#allocation2 + $0x3e0] sm:$0xff] }
 0x480   :  { %2419 = vmatprep.subr.bf16.mxu1 %v2648_v24 }
 0x483   :  { %2421 = vmatpush3.bf16.msra.mxu1 %v2420_v19  ;;  %v2447_v19 = vpack.c.bf16 %v1063_v18, %v1062_v17  ;;  %v2495_v17 = vpack.c.bf16 %v1177_v12, %v1176_v6  ;;  %v1178_v18 = vld [vmem:[#allocation2 + $0x360] sm:$0xff] }
 0x484   :  { %2422 = vmatprep.subr.bf16.mxu1 %v2648_v24 }
 0x487   :  { %2424 = vmatpush3.bf16.msra.mxu1 %v2423_v20  ;;  %v2450_v20 = vpack.c.bf16 %v1065_v14, %v1064_v16 }
 0x488   :  { %2425 = vmatprep.subr.bf16.mxu1 %v2648_v24 }
 0x48b   :  { %2427 = vmatpush3.bf16.msra.mxu1 %v2426_v22  ;;  %v1066_v22 = vld [vmem:[#allocation2 + $0x2f0] sm:$0xff] }
 0x48c   :  { %2428 = vmatprep.subr.bf16.mxu1 %v2648_v24 }
 0x545   :  { %v2022_v28 = vpop.f32.mrb[4].mxu1 }
 0x546   :  { %v825_v29 = vadd.f32 %v2022_v28, %v752_v27  ;;  %v819_v30 = vpop.f32.mrb[5].mxu1  ;;  %v1067_v28 = vld [vmem:[#allocation2 + $0x2f8] sm:$0xff] }
 0x547   :  { %v820_v31 = vadd.f32 %v819_v30, %v752_v27  ;;  %v883_v30 = vsub.s32 4, %v2750_v44 }
 0x548   :  { %vm839_vm15 = vcmp.gt.f32.partialorder %v825_v29, 0.0  ;;  %v843_v32 = vmul.f32 0.2, %v825_v29 }
 0x549   :  { %vm838_vm0 = vcmp.gt.f32.partialorder %v820_v31, 0.0  ;;  %v842_v33 = vmul.f32 0.2, %v820_v31  ;;  %v2025_v7 = vpop.f32.mrb[6].mxu1 }
 0x54a   :  { %v847_v34 = vsel %vm839_vm15, %v825_v29, %v843_v32  ;;  %v835_v35 = vadd.f32 %v2025_v7, %v752_v27  ;;  %v829_v8 = vpop.f32.mrb[7].mxu1  ;;  %v2453_v29 = vpack.c.bf16 %v1067_v28, %v1066_v22  ;;  %v884_v32 = vrot.slane %v2753_v46, %v883_v30  ;;  %v1166_v7 = vld [vmem:[#allocation2 + $0x300] sm:$0xff]  ;;  %v1180_v22 = vld [vmem:[#allocation2 + $0x370] sm:$0xff] }
 0x54b   :  { %v846_v36 = vsel %vm838_vm0, %v820_v31, %v842_v33  ;;  %v830_v37 = vadd.f32 %v829_v8, %v752_v27  ;;  %v2429_v27 = vpack.c.bf16 %v976_v23, %v975_v21  ;;  %v1183_v31 = vld [vmem:[#allocation2 + $0x380] sm:$0xff]  ;;  %v1184_v33 = vld [vmem:[#allocation2 + $0x388] sm:$0xff]  ;;  %v1198_v21 = vld [vmem:[#allocation2 + $0x3f8] sm:$0xff] }
 0x54c   :  { %v850_v38 = vadd.f32 %v847_v34, %v846_v36  ;;  %vm841_vm1 = vcmp.gt.f32.partialorder %v835_v35, 0.0  ;;  %v845_v39 = vmul.f32 0.2, %v835_v35  ;;  %v1167_v34 = vld [vmem:[#allocation2 + $0x308] sm:$0xff]  ;;  %v2456_v8 = vpack.c.bf16 %v1184_v33, %v1183_v31  ;;  %v2852_v23 = vld [vmem:[%s2996_s2] sm:$0xff] }
 0x54d   :  { %vm840_vm2 = vcmp.gt.f32.partialorder %v830_v37, 0.0  ;;  %v844_v9 = vmul.f32 0.2, %v830_v37  ;;  %2430 = vmatpush3.bf16.msra.mxu1 %v2429_v27  ;;  %v2480_v36 = vpack.c.bf16 %v1167_v34, %v1166_v7  ;;  %v1181_v27 = vld [vmem:[#allocation2 + $0x378] sm:$0xff]  ;;  %v1346_v7 = vld [vmem:[#allocation2 + $0x400] sm:$0xff]  ;;  %v1347_v34 = vld [vmem:[#allocation2 + $0x408] sm:$0xff] }
 0x54e   :  { %v851_v40 = vrot.slane %v850_v38, 4  ;;  %v849_v41 = vsel %vm841_vm1, %v835_v35, %v845_v39  ;;  %2455 = vmatprep.subr.bf16.mxu1 %v2648_v24 }
 0x54f   :  { %v848_v42 = vsel %vm840_vm2, %v830_v37, %v844_v9  ;;  %v1185_v37 = vld [vmem:[#allocation2 + $0x390] sm:$0xff]  ;;  %v1186_v9 = vld [vmem:[#allocation2 + $0x398] sm:$0xff] }
 0x550   :  { %v852_v43 = vadd.f32 %v851_v40, %v850_v38  ;;  %v857_v47 = vadd.f32 %v849_v41, %v848_v42  ;;  %v1168_v40 = vld [vmem:[#allocation2 + $0x310] sm:$0xff]  ;;  %v1169_v41 = vld [vmem:[#allocation2 + $0x318] sm:$0xff]  ;;  %v2459_v42 = vpack.c.bf16 %v1186_v9, %v1185_v37 }
 0x552   :  { %v853_v48 = vrot.slane %v852_v43, 2  ;;  %v858_v49 = vrot.slane %v857_v47, 4 }
 0x554   :  { %v854_v50 = vadd.f32 %v853_v48, %v852_v43  ;;  %v859_v51 = vadd.f32 %v858_v49, %v857_v47  ;;  %v2483_v43 = vpack.c.bf16 %v1169_v41, %v1168_v40  ;;  %v1187_v47 = vld [vmem:[#allocation2 + $0x3a0] sm:$0xff]  ;;  %v1188_v48 = vld [vmem:[#allocation2 + $0x3a8] sm:$0xff]  ;;  %v1352_v40 = vld [vmem:[#allocation2 + $0x430] sm:$0xff] }
 0x555   :  { %v1170_v49 = vld [vmem:[#allocation2 + $0x320] sm:$0xff]  ;;  %v1353_v41 = vld [vmem:[#allocation2 + $0x438] sm:$0xff] }
 0x556   :  { %v860_v52 = vrot.slane %v859_v51, 2  ;;  %v855_v53 = vrot.slane %v854_v50, 1 }
 0x558   :  { %v861_v54 = vadd.f32 %v860_v52, %v859_v51  ;;  %v856_v58 = vadd.f32 %v855_v53, %v854_v50  ;;  %v1171_v50 = vld [vmem:[#allocation2 + $0x328] sm:$0xff]  ;;  %v2462_v51 = vpack.c.bf16 %v1188_v48, %v1187_v47  ;;  %v1189_v53 = vld [vmem:[#allocation2 + $0x3b0] sm:$0xff] }
 0x559   :  { %v2486_v52 = vpack.c.bf16 %v1171_v50, %v1170_v49  ;;  %v1355_v47 = vld [vmem:[#allocation2 + $0x448] sm:$0xff]  ;;  %v1356_v49 = vld [vmem:[#allocation2 + $0x450] sm:$0xff]  ;;  %v1357_v50 = vld [vmem:[#allocation2 + $0x458] sm:$0xff] }
 0x55a   :  { %v862_v57 = vrot.slane %v861_v54, 1 }
 0x55c   :  { %v863_v59 = vadd.f32 %v862_v57, %v861_v54  ;;  %v1190_v54 = vld [vmem:[#allocation2 + $0x3b8] sm:$0xff] }
 0x55d   :  { %v2465_v55 = vpack.c.bf16 %v1190_v54, %v1189_v53  ;;  %v1173_v57 = vld [vmem:[#allocation2 + $0x338] sm:$0xff] }
 0x55e   :  { %v888_v1 = vsel %vm887_vm3, %v863_v59, %v856_v58  ;;  %v2489_v58 = vpack.c.bf16 %v1173_v57, %v1172_v56  ;;  %v1191_v59 = vld [vmem:[#allocation2 + $0x3c0] sm:$0xff] }
 0x55f   :  { %2059 = vmatmul.mubr.f32.vlgmr.msra.gmra.mrb[16].mxu0 %v888_v1  ;;  %v1175_v1 = vld [vmem:[#allocation2 + $0x348] sm:$0xff] }
 0x560   :  { %2433 = vmatpush3.bf16.msra.mxu0 %v2432_v60  ;;  %2128 = vmatprep.mubr.msk.f32.mxu0 %vm2649_vm14, %v2650_v62  ;;  %v1192_v60 = vld [vmem:[#allocation2 + $0x3c8] sm:$0xff]  ;;  %v2492_v3 = vpack.c.bf16 %v1175_v1, %v1174_v63  ;;  %v1147_v1 = vrot.slane %v2852_v23, 2 }
 0x561   :  { %2434 = vmatprep.subr.bf16.mxu0 %v2648_v24  ;;  %v2468_v61 = vpack.c.bf16 %v1192_v60, %v1191_v59 }
 0x564   :  { %2436 = vmatpush3.bf16.msra.mxu0 %v2435_v2  ;;  %v2838_v2 = vld [vmem:[#allocation4 + $0x10] sm:$0xff] }
 0x565   :  { %2437 = vmatprep.subr.bf16.mxu0 %v2648_v24  ;;  %v1154_v10 = vrot.slane %v2838_v2, %v633_v26  ;;  %v1159_v14 = vrot.slane %v2838_v2, %v751_v25  ;;  %v1197_v26 = vld [vmem:[#allocation2 + $0x3f0] sm:$0xff] }
 0x566   :  { %v2477_v25 = vpack.c.bf16 %v1198_v21, %v1197_v26  ;;  %v1441_v26 = vld [vmem:[#allocation2 + $0x498] sm:$0xff] }
 0x567   :  { %v1155_v28 = vsub.f32 %v2852_v23, %v1154_v10  ;;  %v1358_v10 = vld [vmem:[#allocation2 + $0x460] sm:$0xff] }
 0x568   :  { %2439 = vmatpush3.bf16.msra.mxu0 %v2438_v5  ;;  %v1194_v5 = vld [vmem:[#allocation2 + $0x3d8] sm:$0xff] }
 0x569   :  { %2440 = vmatprep.subr.bf16.mxu0 %v2648_v24  ;;  %v1160_v30 = vmul.f32 %v1159_v14, %v1155_v28  ;;  %v1440_v14 = vld [vmem:[#allocation2 + $0x490] sm:$0xff] }
 0x56a   :  { %v2531_v21 = vpack.c.bf16 %v1441_v26, %v1440_v14  ;;  %v1562_v14 = vld [vmem:[%s2999_s5 + $0xa8] sm:$0xff] }
 0x56c   :  { %2442 = vmatpush3.bf16.msra.mxu0 %v2441_v11  ;;  %v2471_v11 = vpack.c.bf16 %v1194_v5, %v1193_v4 }
 0x56d   :  { %2443 = vmatprep.subr.bf16.mxu0 %v2648_v24 }
 0x570   :  { %2445 = vmatpush3.bf16.msra.mxu0 %v2444_v15  ;;  %v1196_v15 = vld [vmem:[#allocation2 + $0x3e8] sm:$0xff] }
 0x571   :  { %2446 = vmatprep.subr.bf16.mxu0 %v2648_v24  ;;  %v2474_v16 = vpack.c.bf16 %v1196_v15, %v1195_v13 }
 0x574   :  { %2448 = vmatpush3.bf16.msra.mxu0 %v2447_v19  ;;  %v1179_v19 = vld [vmem:[#allocation2 + $0x368] sm:$0xff] }
 0x575   :  { %2449 = vmatprep.subr.bf16.mxu0 %v2648_v24 }
 0x578   :  { %2451 = vmatpush3.bf16.msra.mxu0 %v2450_v20  ;;  %v2498_v20 = vpack.c.bf16 %v1179_v19, %v1178_v18  ;;  %v1438_v19 = vld [vmem:[#allocation2 + $0x480] sm:$0xff] }
 0x579   :  { %2452 = vmatprep.subr.bf16.mxu0 %v2648_v24 }
 0x57c   :  { %2454 = vmatpush3.bf16.msra.mxu0 %v2453_v29  ;;  %v1161_v29 = vrot.slane %v2852_v23, 4 }
 0x57d   :  { %2479 = vmatprep.subr.bf16.mxu0 %v2648_v24 }
 0x57e   :  { %v1163_v31 = vmul.f32 0.1, %v1161_v29  ;;  %v1444_v29 = vld [vmem:[#allocation2 + $0x4b0] sm:$0xff] }
 0x580   :  { %v1164_v33 = vadd.f32 %v1163_v31, %v1160_v30  ;;  %v1446_v31 = vld [vmem:[#allocation2 + $0x4c0] sm:$0xff] }
 0x632   :  { %v956_v35 = vpop.f32.mrb[16].mxu0 }
 0x633   :  { %v957_v38 = vadd.f32 %v956_v35, %v884_v32  ;;  %v2060_v39 = vpop.f32.mrb[17].mxu0  ;;  %v2501_v32 = vpack.c.bf16 %v1181_v27, %v1180_v22  ;;  %v1348_v35 = vld [vmem:[#allocation2 + $0x410] sm:$0xff]  ;;  %v1442_v22 = vld [vmem:[#allocation2 + $0x4a0] sm:$0xff]  ;;  %v1443_v27 = vld [vmem:[#allocation2 + $0x4a8] sm:$0xff] }
 0x634   :  { %v1351_v39 = vld [vmem:[#allocation2 + $0x428] sm:$0xff]  ;;  %v2534_v28 = vpack.c.bf16 %v1443_v27, %v1442_v22  ;;  %v1561_v22 = vld [vmem:[%s2999_s5 + $0xa0] sm:$0xff]  ;;  %v1563_v27 = vld [vmem:[%s2999_s5 + $0xb0] sm:$0xff] }
 0x635   :  { %2094 = vmatmul.mubr.f32.vlgmr.msra.gmra.mrb[8].mxu1 %v957_v38  ;;  %2129 = vmatmul.mubr.f32.vlgmr.msra.gmra.mrb[18].mxu0 %v957_v38  ;;  %v1350_v38 = vld [vmem:[#allocation2 + $0x420] sm:$0xff] }
 0x636   :  { %2457 = vmatpush3.bf16.msra.mxu1 %v2456_v8  ;;  %2481 = vmatpush3.bf16.msra.mxu0 %v2480_v36  ;;  %v2504_v8 = vpack.c.bf16 %v1347_v34, %v1346_v7  ;;  %v1349_v36 = vld [vmem:[#allocation2 + $0x418] sm:$0xff]  ;;  %v2510_v9 = vpack.c.bf16 %v1351_v39, %v1350_v38  ;;  %v1448_v7 = vld [vmem:[#allocation2 + $0x4d0] sm:$0xff]  ;;  %v1341_v38 = vsub.s32 7, %v2750_v44  ;;  %v2595_v39 = vld [vmem:[#allocation4 + $0x8] sm:$0xff] }
 0x637   :  { %2458 = vmatprep.subr.bf16.mxu1 %v2648_v24  ;;  %2482 = vmatprep.subr.bf16.mxu0 %v2648_v24  ;;  %v2507_v37 = vpack.c.bf16 %v1349_v36, %v1348_v35  ;;  %v1449_v34 = vld [vmem:[#allocation2 + $0x4d8] sm:$0xff]  ;;  %v1451_v36 = vld [vmem:[#allocation2 + $0x4e8] sm:$0xff] }
 0x638   :  { %2163 = vmatprep.mubr.msk.f32.mxu1 %vm2649_vm14, %v2650_v62  ;;  %2198 = vmatprep.mubr.msk.f32.mxu0 %vm2649_vm14, %v2650_v62  ;;  %v2543_v35 = vpack.c.bf16 %v1449_v34, %v1448_v7  ;;  %v1365_v7 = vrot.slane %v2838_v2, %v231_v45  ;;  %v1571_v45 = vld [vmem:[%s2999_s5 + $0xf0] sm:$0xff] }
 0x63a   :  { %2460 = vmatpush3.bf16.msra.mxu1 %v2459_v42  ;;  %2484 = vmatpush3.bf16.msra.mxu0 %v2483_v43  ;;  %v2513_v42 = vpack.c.bf16 %v1353_v41, %v1352_v40  ;;  %v1354_v43 = vld [vmem:[#allocation2 + $0x440] sm:$0xff] }
 0x63b   :  { %2461 = vmatprep.subr.bf16.mxu1 %v2648_v24  ;;  %2485 = vmatprep.subr.bf16.mxu0 %v2648_v24  ;;  %v2516_v48 = vpack.c.bf16 %v1355_v47, %v1354_v43 }
 0x63e   :  { %2463 = vmatpush3.bf16.msra.mxu1 %v2462_v51  ;;  %2487 = vmatpush3.bf16.msra.mxu0 %v2486_v52  ;;  %v2519_v51 = vpack.c.bf16 %v1357_v50, %v1356_v49  ;;  %v1070_v52 = vsub.s32 6, %v2750_v44  ;;  %v1453_v49 = vld [vmem:[#allocation2 + $0x4f8] sm:$0xff] }
 0x63f   :  { %2464 = vmatprep.subr.bf16.mxu1 %v2648_v24  ;;  %2488 = vmatprep.subr.bf16.mxu0 %v2648_v24 }
 0x640   :  { %v1071_v53 = vrot.slane %v2753_v46, %v1070_v52  ;;  %v1541_v52 = vld [vmem:[%s2999_s5] sm:$0xff] }
 0x642   :  { %2466 = vmatpush3.bf16.msra.mxu1 %v2465_v55  ;;  %2490 = vmatpush3.bf16.msra.mxu0 %v2489_v58 }
 0x643   :  { %2467 = vmatprep.subr.bf16.mxu1 %v2648_v24  ;;  %2491 = vmatprep.subr.bf16.mxu0 %v2648_v24 }
 0x646   :  { %2469 = vmatpush3.bf16.msra.mxu1 %v2468_v61  ;;  %2493 = vmatpush3.bf16.msra.mxu0 %v2492_v3  ;;  %v979_v61 = vsub.s32 5, %v2750_v44 }
 0x647   :  { %2470 = vmatprep.subr.bf16.mxu1 %v2648_v24  ;;  %2494 = vmatprep.subr.bf16.mxu0 %v2648_v24 }
 0x648   :  { %v980_v63 = vrot.slane %v2753_v46, %v979_v61  ;;  %v1361_v46 = vld [vmem:[#allocation2 + $0x478] sm:$0xff] }
 0x649   :  { %v1552_v61 = vld [vmem:[%s2999_s5 + $0x58] sm:$0xff] }
 0x64a   :  { %2472 = vmatpush3.bf16.msra.mxu1 %v2471_v11  ;;  %2496 = vmatpush3.bf16.msra.mxu0 %v2495_v17  ;;  %v1359_v11 = vld [vmem:[#allocation2 + $0x468] sm:$0xff]  ;;  %v1360_v17 = vld [vmem:[#allocation2 + $0x470] sm:$0xff] }
 0x64b   :  { %2473 = vmatprep.subr.bf16.mxu1 %v2648_v24  ;;  %2497 = vmatprep.subr.bf16.mxu0 %v2648_v24  ;;  %v2522_v12 = vpack.c.bf16 %v1359_v11, %v1358_v10  ;;  %v2525_v18 = vpack.c.bf16 %v1361_v46, %v1360_v17  ;;  %v1560_v17 = vld [vmem:[%s2999_s5 + $0x98] sm:$0xff] }
 0x64e   :  { %2475 = vmatpush3.bf16.msra.mxu1 %v2474_v16  ;;  %2499 = vmatpush3.bf16.msra.mxu0 %v2498_v20  ;;  %v1439_v16 = vld [vmem:[#allocation2 + $0x488] sm:$0xff] }
 0x64f   :  { %2476 = vmatprep.subr.bf16.mxu1 %v2648_v24  ;;  %2500 = vmatprep.subr.bf16.mxu0 %v2648_v24  ;;  %v2528_v20 = vpack.c.bf16 %v1439_v16, %v1438_v19  ;;  %v1557_v19 = vld [vmem:[%s2999_s5 + $0x80] sm:$0xff]  ;;  %v1559_v16 = vld [vmem:[%s2999_s5 + $0x90] sm:$0xff] }
 0x650   :  { %v2569_v26 = vpack.c.bf16 %v1559_v16, %v1557_v19 }
 0x652   :  { %2478 = vmatpush3.bf16.msra.mxu1 %v2477_v25  ;;  %2502 = vmatpush3.bf16.msra.mxu0 %v2501_v32  ;;  %v1445_v25 = vld [vmem:[#allocation2 + $0x4b8] sm:$0xff]  ;;  %v1447_v32 = vld [vmem:[#allocation2 + $0x4c8] sm:$0xff] }
 0x653   :  { %2503 = vmatprep.subr.bf16.mxu1 %v2648_v24  ;;  %2527 = vmatprep.subr.bf16.mxu0 %v2648_v24  ;;  %v2537_v30 = vpack.c.bf16 %v1445_v25, %v1444_v29  ;;  %v1568_v29 = vld [vmem:[%s2999_s5 + $0xd8] sm:$0xff]  ;;  %v2573_v25 = vpack.c.bf16 %v1563_v27, %v1561_v22 }
 0x655   :  { %2164 = vmatmul.mubr.f32.vlgmr.msra.gmra.mrb[10].mxu1 %v1164_v33  ;;  %v2540_v33 = vpack.c.bf16 %v1447_v32, %v1446_v31  ;;  %v1565_v31 = vld [vmem:[%s2999_s5 + $0xc0] sm:$0xff]  ;;  %v1567_v32 = vld [vmem:[%s2999_s5 + $0xd0] sm:$0xff] }
 0x656   :  { %2233 = vmatprep.mubr.msk.f32.mxu1 %vm2649_vm14, %v2650_v62  ;;  %2505 = vmatpush3.bf16.msra.mxu1 %v2504_v8  ;;  %v1450_v8 = vld [vmem:[#allocation2 + $0x4e0] sm:$0xff] }
 0x657   :  { %2506 = vmatprep.subr.bf16.mxu1 %v2648_v24 }
 0x65a   :  { %2508 = vmatpush3.bf16.msra.mxu1 %v2507_v37  ;;  %v2546_v37 = vpack.c.bf16 %v1451_v36, %v1450_v8 }
 0x65b   :  { %2509 = vmatprep.subr.bf16.mxu1 %v2648_v24 }
 0x65e   :  { %2511 = vmatpush3.bf16.msra.mxu1 %v2510_v9  ;;  %v1342_v9 = vrot.slane %v2595_v39, %v1341_v38  ;;  %v1572_v38 = vld [vmem:[%s2999_s5 + $0xf8] sm:$0xff] }
 0x65f   :  { %2512 = vmatprep.subr.bf16.mxu1 %v2648_v24 }
 0x662   :  { %2514 = vmatpush3.bf16.msra.mxu1 %v2513_v42 }
 0x663   :  { %2515 = vmatprep.subr.bf16.mxu1 %v2648_v24 }
 0x666   :  { %2517 = vmatpush3.bf16.msra.mxu1 %v2516_v48  ;;  %v1452_v48 = vld [vmem:[#allocation2 + $0x4f0] sm:$0xff] }
 0x667   :  { %2518 = vmatprep.subr.bf16.mxu1 %v2648_v24  ;;  %v2549_v50 = vpack.c.bf16 %v1453_v49, %v1452_v48 }
 0x66a   :  { %2520 = vmatpush3.bf16.msra.mxu1 %v2519_v51  ;;  %v1544_v51 = vld [vmem:[%s2999_s5 + $0x18] sm:$0xff] }
 0x66b   :  { %2521 = vmatprep.subr.bf16.mxu1 %v2648_v24 }
 0x66e   :  { %2523 = vmatpush3.bf16.msra.mxu1 %v2522_v12  ;;  %v1553_v12 = vld [vmem:[%s2999_s5 + $0x60] sm:$0xff] }
 0x66f   :  { %2524 = vmatprep.subr.bf16.mxu1 %v2648_v24 }
 0x672   :  { %2526 = vmatpush3.bf16.msra.mxu1 %v2525_v18 }
 0x708   :  { %v1047_v54 = vpop.f32.mrb[8].mxu1  ;;  %v1138_v55 = vpop.f32.mrb[18].mxu0 }
 0x709   :  { %v1139_v56 = vadd.f32 %v1138_v55, %v1071_v53  ;;  %v2095_v57 = vpop.f32.mrb[9].mxu1  ;;  %v2130_v58 = vpop.f32.mrb[19].mxu0  ;;  %v1048_v4 = vadd.f32 %v1047_v54, %v980_v63  ;;  %v1546_v54 = vld [vmem:[%s2999_s5 + $0x28] sm:$0xff]  ;;  %v1548_v55 = vld [vmem:[%s2999_s5 + $0x38] sm:$0xff] }
 0x70a   :  { %v2555_v57 = vpack.c.bf16 %v1548_v55, %v1546_v54  ;;  %v1545_v58 = vld [vmem:[%s2999_s5 + $0x20] sm:$0xff]  ;;  %v2652_v54 = vmov 1.0  }
 0x70b   :  { %v1143_v59 = vmul.f32 0.5, %v1139_v56 }
 0x70d   :  { %v1144_v60 = vmul.f32 1.442695, %v1143_v59  ;;  %v1547_v59 = vld [vmem:[%s2999_s5 + $0x30] sm:$0xff] }
 0x70e   :  { %v2557_v63 = vpack.c.bf16 %v1547_v59, %v1545_v58 }
 0x70f   :  { %2593 = vpow2.f32 %v1144_v60  ;;  %v1550_v60 = vld [vmem:[%s2999_s5 + $0x48] sm:$0xff] }
 0x719   :  { %v2594_v3 = vpop.eup %2593 }
 0x71a   :  { %v1149_v5 = vmul.f32 %v2594_v3, %v1147_v1  ;;  %v2559_v1 = vpack.c.bf16 %v1552_v61, %v1550_v60  ;;  %v1549_v3 = vld [vmem:[%s2999_s5 + $0x40] sm:$0xff] }
 0x71c   :  { %v1150_v6 = vadd.f32 %v1149_v5, %v1048_v4  ;;  %v1551_v4 = vld [vmem:[%s2999_s5 + $0x50] sm:$0xff]  ;;  %v1554_v5 = vld [vmem:[%s2999_s5 + $0x68] sm:$0xff] }
 0x71d   :  { %v2561_v10 = vpack.c.bf16 %v1551_v4, %v1549_v3 }
 0x71e   :  { %2199 = vmatmul.mubr.f32.vlgmr.msra.gmra.mrb[20].mxu0 %v1150_v6  ;;  %v1556_v6 = vld [vmem:[%s2999_s5 + $0x78] sm:$0xff] }
 0x71f   :  { %2268 = vmatprep.mubr.msk.f32.mxu0 %vm2649_vm14, %v2650_v62  ;;  %2529 = vmatpush3.bf16.msra.mxu0 %v2528_v20  ;;  %v2563_v11 = vpack.c.bf16 %v1556_v6, %v1554_v5  ;;  %v1564_v20 = vld [vmem:[%s2999_s5 + $0xb8] sm:$0xff] }
 0x720   :  { %2530 = vmatprep.subr.bf16.mxu0 %v2648_v24 }
 0x723   :  { %2532 = vmatpush3.bf16.msra.mxu0 %v2531_v21  ;;  %v2571_v21 = vpack.c.bf16 %v1564_v20, %v1562_v14 }
 0x724   :  { %2533 = vmatprep.subr.bf16.mxu0 %v2648_v24 }
 0x727   :  { %2535 = vmatpush3.bf16.msra.mxu0 %v2534_v28  ;;  %v1566_v28 = vld [vmem:[%s2999_s5 + $0xc8] sm:$0xff] }
 0x728   :  { %v1265_v13 = vpop.f32.mrb[10].mxu1  ;;  %2536 = vmatprep.subr.bf16.mxu0 %v2648_v24 }
 0x729   :  { %v2165_v15 = vpop.f32.mrb[11].mxu1 }
 0x72a   :  { %v1558_v15 = vld [vmem:[%s2999_s5 + $0x88] sm:$0xff] }
 0x72b   :  { %2538 = vmatpush3.bf16.msra.mxu0 %v2537_v30  ;;  %v2567_v18 = vpack.c.bf16 %v1560_v17, %v1558_v15  ;;  %v2575_v30 = vpack.c.bf16 %v1568_v29, %v1566_v28 }
 0x72c   :  { %2539 = vmatprep.subr.bf16.mxu0 %v2648_v24 }
 0x72f   :  { %2541 = vmatpush3.bf16.msra.mxu0 %v2540_v33  ;;  %v2577_v33 = vpack.c.bf16 %v1567_v32, %v1565_v31 }
 0x730   :  { %2542 = vmatprep.subr.bf16.mxu0 %v2648_v24 }
 0x733   :  { %2544 = vmatpush3.bf16.msra.mxu0 %v2543_v35 }
 0x734   :  { %2545 = vmatprep.subr.bf16.mxu0 %v2648_v24 }
 0x737   :  { %2547 = vmatpush3.bf16.msra.mxu0 %v2546_v37  ;;  %v1570_v37 = vld [vmem:[%s2999_s5 + $0xe8] sm:$0xff] }
 0x738   :  { %2548 = vmatprep.subr.bf16.mxu0 %v2648_v24  ;;  %v1542_v24 = vld [vmem:[%s2999_s5 + $0x8] sm:$0xff]  ;;  %v2579_v39 = vpack.c.bf16 %v1572_v38, %v1570_v37 }
 0x739   :  { %v2551_v53 = vpack.c.bf16 %v1544_v51, %v1542_v24 }
 0x73b   :  { %2550 = vmatpush3.bf16.msra.mxu0 %v2549_v50  ;;  %2552 = vmatprep.subr.bf16.mxu1 %v2551_v53  ;;  %v1457_v50 = vrot.slane %v2838_v2, %v361_v0 }
 0x7f1   :  { %v1335_v40 = vpop.f32.mrb[20].mxu0 }
 0x7f2   :  { %v1336_v41 = vadd.f32 %v1335_v40, %v1265_v13  ;;  %v2200_v42 = vpop.f32.mrb[21].mxu0  ;;  %v1555_v13 = vld [vmem:[%s2999_s5 + $0x70] sm:$0xff] }
 0x7f3   :  { %v2565_v46 = vpack.c.bf16 %v1555_v13, %v1553_v12 }
 0x7f4   :  { %v1343_v43 = vadd.f32 %v1342_v9, %v1336_v41  ;;  %v1569_v9 = vld [vmem:[%s2999_s5 + $0xe0] sm:$0xff]  ;;  %v2651_v41 = vmov 1983009808  }
 0x7f5   :  { %v2581_v40 = vpack.c.bf16 %v1571_v45, %v1569_v9  ;;  %v1530_v42 = vunpack.c.l.s4 %v2651_v41 }
 0x7f6   :  { %v1344_v47 = vmax.f32 %v1343_v43, 0.0 }
 0x7f7   :  { %v1531_v43 = vunpack.c.0.s8 %v1530_v42 }
 0x7f8   :  { %2234 = vmatmul.mubr.f32.vlgmr.msra.gmra.mrb[12].mxu1 %v1344_v47  ;;  %v1528_v47 = vcombine.high %v2852_v23, %v2852_v23 }
 0x7f9   :  { %1637 = vmatprep.mubr.f32.mxu1 %v2650_v62  ;;  %v1543_v62 = vld [vmem:[%s2999_s5 + $0x10] sm:$0xff]  ;;  %v1534_v48 = vsub.s32 %v1531_v43, %v2750_v44 }
 0x7fa   :  { %v2553_v56 = vpack.c.bf16 %v1543_v62, %v1541_v52 }
 0x7fb   :  { %v1535_v49 = vrot.slane %v1528_v47, %v1534_v48 }
 0x7fc   :  { %2554 = vmatpush1.bf16.msra.mxu1 %v2553_v56 }
 0x7fd   :  { %2556 = vmatprep.subr.bf16.mxu1 %v2555_v57  ;;  %v1536_v24 = vcombine.high %v1535_v49, %v1535_v49 }
 0x800   :  { %2558 = vmatpush1.bf16.msra.mxu1 %v2557_v63 }
 0x801   :  { %2560 = vmatprep.subr.bf16.mxu1 %v2559_v1 }
 0x804   :  { %2562 = vmatpush1.bf16.msra.mxu1 %v2561_v10 }
 0x805   :  { %2564 = vmatprep.subr.bf16.mxu1 %v2563_v11 }
 0x808   :  { %2566 = vmatpush1.bf16.msra.mxu1 %v2565_v46 }
 0x809   :  { %2568 = vmatprep.subr.bf16.mxu1 %v2567_v18 }
 0x80c   :  { %2570 = vmatpush1.bf16.msra.mxu1 %v2569_v26 }
 0x80d   :  { %2572 = vmatprep.subr.bf16.mxu1 %v2571_v21 }
 0x810   :  { %2574 = vmatpush1.bf16.msra.mxu1 %v2573_v25 }
 0x811   :  { %2576 = vmatprep.subr.bf16.mxu1 %v2575_v30 }
 0x814   :  { %2578 = vmatpush1.bf16.msra.mxu1 %v2577_v33 }
 0x815   :  { %2580 = vmatprep.subr.bf16.mxu1 %v2579_v39 }
 0x818   :  { %2582 = vmatpush1.bf16.msra.mxu1 %v2581_v40 }
 0x8cb   :  { %v1432_v34 = vpop.f32.mrb[12].mxu1 }
 0x8cc   :  { %v1433_v35 = vadd.f32 %v1432_v34, %v1365_v7  ;;  %v2235_v8 = vpop.f32.mrb[13].mxu1 }
 0x8ce   :  { %v1436_v36 = vmax.f32 %v1433_v35, 0.0 }
 0x8d0   :  { %2269 = vmatmul.mubr.f32.vlgmr.msra.gmra.mrb[22].mxu0 %v1436_v36 }
 0x9a3   :  { %v1524_v51 = vpop.f32.mrb[22].mxu0 }
 0x9a4   :  { %v1525_v52 = vadd.f32 %v1524_v51, %v1457_v50  ;;  %v2270_v53 = vpop.f32.mrb[23].mxu0 }
 0x9a6   :  { %v1538_v62 = vadd.f32 %v1536_v24, %v1525_v52 }
 0x9a8   :  { %vm1539_vm4 = vcmp.ge.f32.partialorder %v1538_v62, 0.0 }
 0x9a9   :  { %1674 = vmatmul.mubr.msk.f32.vlgmr.msra.gmra.mrb[14].mxu1 %vm1539_vm4, %v2652_v54 }
 0xa7c   :  { %v1639_v55 = vpop.f32.mrb[14].mxu1 }
 0xa7d   :  { %v1641_v56 = vpop.f32.mrb[15].mxu1 }
 0xa7e   :  { %v1646_v57 = vcombine.low %v1639_v55, %v1641_v56 }
 0xa80   :  { %1675 = vst.sshfl [vmem:[%s3000_s6] sm:$0x33 pattern:$0x76325410] %v1646_v57 }
 0xa81   :  { %1660 = vsyncpa [#allocation3], 1 }
 0xa82   :  { %1661 = vsyncpa [#allocation5], 1 }

</bundles_post_ra>
